<compile_context>
chip_gen: v7x
topology: tpu7x:2x2x1
jax: 0.10.0
libtpu: 0.0.40
codegen_flags: <defaults>
</compile_context>

<pallas_src>
import functools

import jax
import jax.numpy as jnp
import numpy as np
from jax import lax
from jax.experimental import pallas as pl
from jax.experimental.pallas import tpu as pltpu

_LANE = 128
_SUBLANE = 8
_MAX_TILE_ROWS = 512  # rows per streaming tile (512 -> ~85% of HBM roofline)

# output lane slots
(SLOT_TOTAL, SLOT_RGB, SLOT_MASK, SLOT_SDF, SLOT_EIK, SLOT_LBS, SLOT_POSE,
 SLOT_SHAPE, SLOT_DX, SLOT_LAT, SLOT_NORMAL) = range(11)


def _round_up(n, m):
    return ((n + m - 1) // m) * m


def _pad_to_rows(x, rows, fill=0.0):
    """Flatten to 1-D f32, pad with `fill` to rows*128, reshape (rows, 128)."""
    v = jnp.asarray(x, jnp.float32).reshape(-1)
    n = int(v.shape[0])
    total = rows * _LANE
    if total != n:
        v = jnp.pad(v, (0, total - n), constant_values=fill)
    return v.reshape(rows, _LANE)


def _small_rows(n):
    return _round_up(pl.cdiv(max(int(n), 1), _LANE), _SUBLANE)


# ----------------------------------------------------------------------------
# Fused loss kernel
# ----------------------------------------------------------------------------
def _fused_loss_kernel(*refs, flags, scales, weights, nsteps):
    it = iter(refs)
    pm_ref = next(it)
    omm_ref = next(it)
    rgbp_ref = next(it)
    rgbg_ref = next(it)
    if flags["normal"]:
        nimg_ref = next(it)
        mo3_ref = next(it)
        om3_ref = next(it)
        go_ref = next(it)
        gr_ref = next(it)
    if flags["sdf"]:
        sdf_ref = next(it)
        gx_ref = next(it)
        gy_ref = next(it)
        gz_ref = next(it)
    if flags["lbs"]:
        lbsp_ref = next(it)
        lbsg_ref = next(it)
        posep_ref = next(it)
        poseg_ref = next(it)
        sdp_ref = next(it)
        sdg_ref = next(it)
        sdw_ref = next(it)
    if flags["deform"]:
        dx_ref = next(it)
    if flags["latent"]:
        lat_ref = next(it)
    o_ref = next(it)
    acc_mask = next(it)
    acc_rgb = next(it)
    acc_nrm = next(it) if flags["normal"] else None

    i = pl.program_id(0)

    @pl.when(i == 0)
    def _init():
        acc_mask[...] = jnp.zeros_like(acc_mask)
        acc_rgb[...] = jnp.zeros_like(acc_rgb)
        if flags["normal"]:
            acc_nrm[...] = jnp.zeros_like(acc_nrm)

    # ---- streaming accumulation: pure VPU elementwise, no per-step reduce ----
    acc_mask[...] += jnp.abs(pm_ref[...] - omm_ref[...])
    acc_rgb[...] += jnp.abs(rgbp_ref[...] - rgbg_ref[...])
    if flags["normal"]:
        n = nimg_ref[...]
        m = mo3_ref[...]
        om = om3_ref[...]
        orig = (n * (1.0 - m) + m) * om + (1.0 - om)
        rend = (n * m + (1.0 - m)) * om + (1.0 - om)
        # padding sentinel: n = m = om = 0 -> orig = rend = 1, and go / gr are
        # padded with 1.0 on the wrapper side, so the ragged tail contributes 0
        # (no in-kernel iota mask needed on the hot path).
        acc_nrm[...] += jnp.abs(orig - go_ref[...]) + jnp.abs(rend - gr_ref[...])

    # ---- finalize: single cross-lane reduces + lane-dense output store ----
    @pl.when(i == nsteps - 1)
    def _finalize():
        vals = {}
        vals[SLOT_MASK] = jnp.sum(acc_mask[...]) * scales[SLOT_MASK]
        vals[SLOT_RGB] = jnp.sum(acc_rgb[...]) * scales[SLOT_RGB]
        if flags["normal"]:
            vals[SLOT_NORMAL] = jnp.sum(acc_nrm[...]) * scales[SLOT_NORMAL]
        if flags["sdf"]:
            s = sdf_ref[...]
            vals[SLOT_SDF] = jnp.sum(s * s) * scales[SLOT_SDF]
            gx = gx_ref[...]
            gy = gy_ref[...]
            gz = gz_ref[...]
            nrm = jnp.sqrt(gx * gx + gy * gy + gz * gz)  # padded lanes -> norm 1
            vals[SLOT_EIK] = jnp.sum((nrm - 1.0) ** 2) * scales[SLOT_EIK]
        if flags["lbs"]:
            d = lbsp_ref[...] - lbsg_ref[...]
            vals[SLOT_LBS] = jnp.sum(d * d) * scales[SLOT_LBS]
            d = posep_ref[...] - poseg_ref[...]
            vals[SLOT_POSE] = jnp.sum(d * d) * scales[SLOT_POSE]
            d = sdp_ref[...] - sdg_ref[...]
            vals[SLOT_SHAPE] = jnp.sum(d * d * sdw_ref[...]) * scales[SLOT_SHAPE]
        if flags["deform"]:
            x = dx_ref[...]
            vals[SLOT_DX] = jnp.sum(x * x) * scales[SLOT_DX]
        if flags["latent"]:
            x = lat_ref[...]
            vals[SLOT_LAT] = jnp.sum(x * x) * scales[SLOT_LAT]

        total = jnp.float32(0.0)
        for slot, w in weights.items():
            total = total + vals[slot] * w
        vals[SLOT_TOTAL] = total

        lanes = lax.broadcasted_iota(jnp.int32, (1, _LANE), 1)
        outv = jnp.zeros((1, _LANE), jnp.float32)
        for slot, v in vals.items():
            outv = jnp.where(lanes == slot, v, outv)
        o_ref[...] = outv


# ----------------------------------------------------------------------------
# Glue (gathers) in plain JAX
# ----------------------------------------------------------------------------
def get_gt_blendshape(index_batch, flame_lbs_weights, flame_posedirs, flame_shapedirs, ghostbone):
    gathered = flame_lbs_weights[index_batch, :]
    if ghostbone:
        gt_lbs = jnp.concatenate(
            [jnp.zeros((index_batch.shape[0], 1), gathered.dtype), gathered], axis=1
        )
    else:
        gt_lbs = gathered
    gt_shapedirs = flame_shapedirs[index_batch, :, 100:]
    gt_posedirs = jnp.swapaxes(flame_posedirs.reshape(36, -1, 3), 0, 1)[index_batch, :, :]
    return {"gt_lbs_weights": gt_lbs, "gt_posedirs": gt_posedirs, "gt_shapedirs": gt_shapedirs}


# ----------------------------------------------------------------------------
# Forward pass: one fused pallas_call
# ----------------------------------------------------------------------------
def loss_forward(model_outputs, ground_truth, cfg, var_expression=None,
                 max_tile_rows=_MAX_TILE_ROWS):
    if cfg.get("vgg_feature_weight", 0) > 0:
        # TODO(synk): VGGPerceptualLoss (pretrained VGG16) has no in-script Pallas equivalent.
        raise NotImplementedError("vgg perceptual loss not supported")

    flags = {
        "normal": cfg["normal_weight"] > 0,
        "sdf": cfg["sdf_consistency_weight"] > 0,
        "lbs": cfg["lbs_weight"] != 0,
        "deform": cfg["optimize_scene_latent_code"] and cfg["deform_pcd_weight"] > 0,
        "latent": cfg["optimize_scene_latent_code"] and cfg["latent_reg_weight"] > 0,
    }
    if flags["sdf"]:
        assert cfg["eikonal_weight"] > 0

    pm = jnp.asarray(model_outputs["predicted_mask"], jnp.float32)
    omask = jnp.asarray(ground_truth["object_mask"], jnp.float32)
    rgb_p = jnp.asarray(model_outputs["rgb_image"], jnp.float32)
    rgb_g = jnp.asarray(ground_truth["rgb"], jnp.float32)

    n_mask = int(np.prod(pm.shape))
    n_rgb = int(np.prod(rgb_p.shape))
    n3 = n_rgb
    n_norm = 0
    if flags["normal"]:
        nimg = jnp.asarray(model_outputs["normal_image"], jnp.float32).reshape(-1, 3)
        p_norm = int(nimg.shape[0])
        n_norm = p_norm * 3
        n3 = max(n3, n_norm)

    # streaming layout: one grid axis shared by the P-sized and 3P-sized streams
    rows3_min = _round_up(pl.cdiv(n3, _LANE), _SUBLANE)
    if rows3_min <= max_tile_rows:
        tile3, nsteps = rows3_min, 1
    else:
        tile3 = _round_up(max_tile_rows, _SUBLANE)
        nsteps = pl.cdiv(rows3_min, tile3)
    rows3 = tile3 * nsteps
    rowsp_min = _round_up(pl.cdiv(n_mask, _LANE), _SUBLANE)
    tilep = _round_up(pl.cdiv(rowsp_min, nsteps), _SUBLANE)
    rowsp = tilep * nsteps

    in_arrays, in_specs = [], []

    def add(arr, block, index_map):
        in_arrays.append(arr)
        in_specs.append(pl.BlockSpec(block, index_map))

    stream_map = lambda i: (i, 0)
    const_map = lambda i: (0, 0)

    # --- always-on streaming losses (mask L1, rgb L1) ---
    add(_pad_to_rows(pm, rowsp), (tilep, _LANE), stream_map)
    add(_pad_to_rows(omask, rowsp), (tilep, _LANE), stream_map)
    add(_pad_to_rows(rgb_p, rows3), (tile3, _LANE), stream_map)
    add(_pad_to_rows(rgb_g, rows3), (tile3, _LANE), stream_map)

    scales, weights = {}, {}
    scales[SLOT_MASK] = 1.0 / n_mask
    scales[SLOT_RGB] = 1.0 / n_rgb
    weights[SLOT_RGB] = 1.0
    weights[SLOT_MASK] = float(cfg["mask_weight"])

    if flags["normal"]:
        mo = jnp.asarray(ground_truth["mask_object"], jnp.float32).reshape(-1, 1)
        om = omask.reshape(-1, 1)
        mo3 = jnp.broadcast_to(mo, (p_norm, 3))
        om3 = jnp.broadcast_to(om, (p_norm, 3))
        go = jnp.asarray(ground_truth["normal_original"], jnp.float32)
        gr = jnp.asarray(ground_truth["normal_rendering"], jnp.float32)
        # nimg/mo3/om3 pad with 0 (blend evaluates to 1 there), go/gr pad with 1.0
        # so the padded tail contributes exactly zero to the L1 accumulator.
        for x in (nimg, mo3, om3):
            add(_pad_to_rows(x, rows3, fill=0.0), (tile3, _LANE), stream_map)
        for x in (go, gr):
            add(_pad_to_rows(x, rows3, fill=1.0), (tile3, _LANE), stream_map)
        scales[SLOT_NORMAL] = 1.0 / n_norm
        weights[SLOT_NORMAL] = float(cfg["normal_weight"])

    if flags["sdf"]:
        sdf = jnp.asarray(model_outputs["sdf_values"], jnp.float32)
        n_sdf = int(np.prod(sdf.shape))
        rows_s = _small_rows(n_sdf)
        add(_pad_to_rows(sdf, rows_s), (rows_s, _LANE), const_map)

        g = jnp.asarray(model_outputs["grad_thetas"], jnp.float32)
        assert g.ndim == 2 and g.shape[1] == 3
        m_eik = int(g.shape[0])
        rows_g = _small_rows(m_eik)
        tot_g = rows_g * _LANE
        gx = jnp.pad(g[:, 0], (0, tot_g - m_eik), constant_values=1.0).reshape(rows_g, _LANE)
        gy = jnp.pad(g[:, 1], (0, tot_g - m_eik)).reshape(rows_g, _LANE)
        gz = jnp.pad(g[:, 2], (0, tot_g - m_eik)).reshape(rows_g, _LANE)
        for x in (gx, gy, gz):
            add(x, (rows_g, _LANE), const_map)

        scales[SLOT_SDF] = 1.0 / n_sdf
        scales[SLOT_EIK] = 1.0 / m_eik
        weights[SLOT_SDF] = float(cfg["sdf_consistency_weight"])
        weights[SLOT_EIK] = float(cfg["eikonal_weight"])

    if flags["lbs"]:
        lbs_w = jnp.asarray(model_outputs["lbs_weights"], jnp.float32)
        num_points = int(lbs_w.shape[0])
        ghostbone = lbs_w.shape[-1] == 6
        gts = get_gt_blendshape(
            model_outputs["index_batch"],
            jnp.asarray(model_outputs["flame_lbs_weights"], jnp.float32),
            jnp.asarray(model_outputs["flame_posedirs"], jnp.float32),
            jnp.asarray(model_outputs["flame_shapedirs"], jnp.float32),
            ghostbone,
        )
        lbs_gt = gts["gt_lbs_weights"].reshape(num_points, -1)
        n_lbs = int(np.prod(lbs_w.shape))
        rows_l = _small_rows(n_lbs)
        add(_pad_to_rows(lbs_w, rows_l), (rows_l, _LANE), const_map)
        add(_pad_to_rows(lbs_gt, rows_l), (rows_l, _LANE), const_map)

        pose_p = jnp.asarray(model_outputs["posedirs"], jnp.float32).reshape(num_points, -1)
        pose_g = gts["gt_posedirs"].reshape(num_points, -1)
        n_pose = int(np.prod(pose_p.shape))
        rows_pd = _small_rows(n_pose)
        add(_pad_to_rows(pose_p, rows_pd), (rows_pd, _LANE), const_map)
        add(_pad_to_rows(pose_g, rows_pd), (rows_pd, _LANE), const_map)

        C = 50 * 3
        sd_p = jnp.asarray(model_outputs["shapedirs"], jnp.float32).reshape(num_points, -1)[:, :C]
        sd_g = gts["gt_shapedirs"].reshape(num_points, -1)
        rows_sd = _round_up(num_points, _SUBLANE)
        Cp = _round_up(C, _LANE)

        def pad2d(x):
            return jnp.zeros((rows_sd, Cp), jnp.float32).at[: x.shape[0], : x.shape[1]].set(x)

        add(pad2d(sd_p), (rows_sd, Cp), const_map)
        add(pad2d(sd_g), (rows_sd, Cp), const_map)
        if var_expression is not None:
            # torch: var_expression.unsqueeze(1).expand(1,3,-1).reshape(1,-1)
            var_flat = jnp.tile(jnp.asarray(var_expression, jnp.float32).reshape(1, -1), (1, 3))
            w_row = 2.0 / var_flat  # folds (10x)^2 / (var * 50) = 2 / var
        else:
            w_row = jnp.full((1, C), 100.0, jnp.float32)  # folds the (10x)^2 pre-scale
        sdw = jnp.zeros((1, Cp), jnp.float32).at[:, :C].set(w_row)
        add(sdw, (1, Cp), const_map)

        n_shape = num_points * C
        scales[SLOT_LBS] = 1.0 / n_lbs
        scales[SLOT_POSE] = 100.0 / n_pose   # folded x10 pre-scale
        scales[SLOT_SHAPE] = 1.0 / n_shape   # weight row already holds the scaling
        weights[SLOT_LBS] = float(cfg["lbs_weight"]) * 0.1
        weights[SLOT_POSE] = float(cfg["lbs_weight"]) * 10.0
        weights[SLOT_SHAPE] = float(cfg["lbs_weight"]) * 10.0

    if flags["deform"]:
        dx = jnp.asarray(model_outputs["delta_x"], jnp.float32)
        n_dx = int(np.prod(dx.shape))
        rows_dx = _small_rows(n_dx)
        add(_pad_to_rows(dx, rows_dx), (rows_dx, _LANE), const_map)
        scales[SLOT_DX] = 1.0 / n_dx
        weights[SLOT_DX] = float(cfg["deform_pcd_weight"])

    if flags["latent"]:
        lat = jnp.asarray(model_outputs["scene_latent_code"], jnp.float32)
        n_lat = int(np.prod(lat.shape))
        rows_lat = _small_rows(n_lat)
        add(_pad_to_rows(lat, rows_lat), (rows_lat, _LANE), const_map)
        scales[SLOT_LAT] = 1.0 / n_lat
        weights[SLOT_LAT] = float(cfg["latent_reg_weight"])

    scratch = [pltpu.VMEM((tilep, _LANE), jnp.float32),
               pltpu.VMEM((tile3, _LANE), jnp.float32)]
    if flags["normal"]:
        scratch.append(pltpu.VMEM((tile3, _LANE), jnp.float32))

    kernel = functools.partial(
        _fused_loss_kernel,
        flags=flags, scales=scales, weights=weights, nsteps=nsteps,
    )

    out_vec = pl.pallas_call(
        kernel,
        out_shape=jax.ShapeDtypeStruct((1, _LANE), jnp.float32),
        grid=(nsteps,),
        in_specs=in_specs,
        out_specs=pl.BlockSpec((1, _LANE), lambda i: (0, 0)),
        scratch_shapes=scratch,
        compiler_params=pltpu.CompilerParams(dimension_semantics=("arbitrary",)),
    )(*in_arrays)

    sums = out_vec[0]
    out = {
        "loss": sums[SLOT_TOTAL],
        "rgb_loss": sums[SLOT_RGB],
        "mask_loss": sums[SLOT_MASK],
    }
    if flags["sdf"]:
        out["sdf_consistency"] = sums[SLOT_SDF]
        out["eikonal"] = sums[SLOT_EIK]
    if flags["lbs"]:
        out["lbs_loss"] = sums[SLOT_LBS]
        out["posedirs_loss"] = sums[SLOT_POSE]
        out["shapedirs_loss"] = sums[SLOT_SHAPE]
    if flags["deform"]:
        out["deform_pcd_loss"] = sums[SLOT_DX]
    if flags["latent"]:
        out["latent_reg_loss"] = sums[SLOT_LAT]
    if flags["normal"]:
        out["normal_loss"] = sums[SLOT_NORMAL]
    return out


# ----------------------------------------------------------------------------
# Pure-JAX reference (mirrors the PyTorch math) for verification
# ----------------------------------------------------------------------------
def loss_forward_ref(mo, gt, cfg, var_expression):
    def l1(a, b):
        return jnp.mean(jnp.abs(a.reshape(-1).astype(jnp.float32) - b.reshape(-1).astype(jnp.float32)))

    mask_loss = l1(mo["predicted_mask"], gt["object_mask"])
    rgb_loss = l1(mo["rgb_image"], gt["rgb"])
    loss = rgb_loss + cfg["mask_weight"] * mask_loss
    out = {"loss": loss, "rgb_loss": rgb_loss, "mask_loss": mask_loss}

    sdf_c = jnp.mean(mo["sdf_values"] * mo["sdf_values"])
    eik = jnp.mean((jnp.linalg.norm(mo["grad_thetas"], axis=1) - 1.0) ** 2)
    out["loss"] += sdf_c * cfg["sdf_consistency_weight"] + eik * cfg["eikonal_weight"]
    out["sdf_consistency"], out["eikonal"] = sdf_c, eik

    N = mo["lbs_weights"].shape[0]
    gts = get_gt_blendshape(
        mo["index_batch"], mo["flame_lbs_weights"], mo["flame_posedirs"], mo["flame_shapedirs"], True
    )
    lbs_loss = jnp.mean((mo["lbs_weights"].reshape(N, -1) - gts["gt_lbs_weights"].reshape(N, -1)) ** 2)
    pose_loss = jnp.mean(
        (mo["posedirs"].reshape(N, -1) * 10 - gts["gt_posedirs"].reshape(N, -1) * 10) ** 2
    )
    var_flat = jnp.tile(var_expression.reshape(1, -1), (1, 3))
    sd_loss = jnp.mean(
        ((mo["shapedirs"].reshape(N, -1)[:, :150] * 10 - gts["gt_shapedirs"].reshape(N, -1) * 10) ** 2)
        / var_flat
        / 50.0
    )
    out["loss"] += lbs_loss * cfg["lbs_weight"] * 0.1 + pose_loss * cfg["lbs_weight"] * 10.0
    out["loss"] += sd_loss * cfg["lbs_weight"] * 10.0
    out["lbs_loss"], out["posedirs_loss"], out["shapedirs_loss"] = lbs_loss, pose_loss, sd_loss

    dpl = jnp.mean(mo["delta_x"] * mo["delta_x"])
    lrl = jnp.mean(mo["scene_latent_code"] * mo["scene_latent_code"])
    out["loss"] += dpl * cfg["deform_pcd_weight"] + lrl * cfg["latent_reg_weight"]
    out["deform_pcd_loss"], out["latent_reg_loss"] = dpl, lrl

    n = mo["normal_image"].reshape(-1, 3)
    m = gt["mask_object"].reshape(-1, 1).astype(jnp.float32)
    om = gt["object_mask"].reshape(-1, 1).astype(jnp.float32)
    orig = (n * (1 - m) + m) * om + (1 - om)
    rend = (n * m + (1 - m)) * om + (1 - om)
    nl = jnp.mean(jnp.abs(orig - gt["normal_original"].reshape(-1, 3))) + jnp.mean(
        jnp.abs(rend - gt["normal_rendering"].reshape(-1, 3))
    )
    out["loss"] += nl * cfg["normal_weight"]
    out["normal_loss"] = nl
    return out


if __name__ == "__main__":
    key = jax.random.PRNGKey(0)
    ks = jax.random.split(key, 20)

    P = 1000     # rays / pixels (deliberately not a multiple of 128 -> ragged tail)
    N = 100      # canonical points
    V = 64       # flame vertices
    M = 200      # sdf samples (not a multiple of 128 -> eikonal sentinel padding)

    cfg = dict(
        mask_weight=1.0,
        lbs_weight=1.0,
        sdf_consistency_weight=0.1,
        eikonal_weight=0.1,
        vgg_feature_weight=0.0,
        optimize_scene_latent_code=True,
        deform_pcd_weight=0.01,
        latent_reg_weight=0.01,
        normal_weight=0.5,
    )
    var_expression = jax.random.uniform(ks[0], (1, 50), jnp.float32, 0.5, 1.5)

    model_outputs = {
        "predicted_mask": jax.random.uniform(ks[1], (1, P), jnp.float32),
        "rgb_image": jax.random.uniform(ks[2], (1, P, 3), jnp.float32),
        "sdf_values": jax.random.normal(ks[3], (M, 1), jnp.float32) * 0.1,
        "grad_thetas": jax.random.normal(ks[4], (M, 3), jnp.float32),
        "lbs_weights": jax.random.uniform(ks[5], (N, 6), jnp.float32),
        "index_batch": jax.random.randint(ks[6], (N,), 0, V),
        "flame_lbs_weights": jax.random.uniform(ks[7], (V, 5), jnp.float32),
        "flame_posedirs": jax.random.normal(ks[8], (36, V * 3), jnp.float32) * 0.01,
        "flame_shapedirs": jax.random.normal(ks[9], (V, 3, 150), jnp.float32) * 0.01,
        "posedirs": jax.random.normal(ks[10], (N, 36, 3), jnp.float32) * 0.01,
        "shapedirs": jax.random.normal(ks[11], (N, 3, 50), jnp.float32) * 0.01,
        "delta_x": jax.random.normal(ks[12], (N, 3), jnp.float32) * 0.05,
        "scene_latent_code": jax.random.normal(ks[13], (1, 32), jnp.float32),
        "normal_image": jax.random.uniform(ks[14], (1, P, 3), jnp.float32),
    }
    ground_truth = {
        "object_mask": (jax.random.uniform(ks[15], (1, P)) > 0.5).astype(jnp.float32),
        "rgb": jax.random.uniform(ks[16], (1, P, 3), jnp.float32),
        "mask_object": (jax.random.uniform(ks[17], (1, P)) > 0.5).astype(jnp.float32),
        "normal_original": jax.random.uniform(ks[18], (1, P, 3), jnp.float32),
        "normal_rendering": jax.random.uniform(ks[19], (1, P, 3), jnp.float32),
    }

    ref = loss_forward_ref(model_outputs, ground_truth, cfg, var_expression)

    # single-step grid (default tiling)
    out = loss_forward(model_outputs, ground_truth, cfg, var_expression)
    out = jax.tree_util.tree_map(jax.block_until_ready, out)
    for k in ref:
        np.testing.assert_allclose(np.asarray(out[k]), np.asarray(ref[k]), rtol=1e-4, atol=1e-5)

    # multi-step grid (force small tiles to exercise init / accumulate / finalize)
    out2 = loss_forward(model_outputs, ground_truth, cfg, var_expression, max_tile_rows=8)
    out2 = jax.tree_util.tree_map(jax.block_until_ready, out2)
    for k in ref:
        np.testing.assert_allclose(np.asarray(out2[k]), np.asarray(ref[k]), rtol=1e-4, atol=1e-5)

    print("KERNEL_OK")
</pallas_src>

<mosaic_0001>
module attributes {stable_mosaic.version = 11 : i64} {
  func.func @_fused_loss_kernel(%arg0: i32, %arg1: memref<8x128xf32, #tpu.memory_space<vmem>>, %arg2: memref<8x128xf32, #tpu.memory_space<vmem>>, %arg3: memref<24x128xf32, #tpu.memory_space<vmem>>, %arg4: memref<24x128xf32, #tpu.memory_space<vmem>>, %arg5: memref<24x128xf32, #tpu.memory_space<vmem>>, %arg6: memref<24x128xf32, #tpu.memory_space<vmem>>, %arg7: memref<24x128xf32, #tpu.memory_space<vmem>>, %arg8: memref<24x128xf32, #tpu.memory_space<vmem>>, %arg9: memref<24x128xf32, #tpu.memory_space<vmem>>, %arg10: memref<8x128xf32, #tpu.memory_space<vmem>>, %arg11: memref<8x128xf32, #tpu.memory_space<vmem>>, %arg12: memref<8x128xf32, #tpu.memory_space<vmem>>, %arg13: memref<8x128xf32, #tpu.memory_space<vmem>>, %arg14: memref<8x128xf32, #tpu.memory_space<vmem>>, %arg15: memref<8x128xf32, #tpu.memory_space<vmem>>, %arg16: memref<88x128xf32, #tpu.memory_space<vmem>>, %arg17: memref<88x128xf32, #tpu.memory_space<vmem>>, %arg18: memref<104x256xf32, #tpu.memory_space<vmem>>, %arg19: memref<104x256xf32, #tpu.memory_space<vmem>>, %arg20: memref<1x256xf32, #tpu.memory_space<vmem>>, %arg21: memref<8x128xf32, #tpu.memory_space<vmem>>, %arg22: memref<8x128xf32, #tpu.memory_space<vmem>>, %arg23: memref<1x128xf32, #tpu.memory_space<vmem>>, %arg24: memref<8x128xf32, #tpu.memory_space<vmem>>, %arg25: memref<24x128xf32, #tpu.memory_space<vmem>>, %arg26: memref<24x128xf32, #tpu.memory_space<vmem>>) attributes {dimension_semantics = [#tpu.dimension_semantics<arbitrary>], iteration_bounds = array<i64: 1>, scalar_prefetch = 0 : i64, scratch_operands = 3 : i64, tpu.core_type = #tpu.core_type<tc>, window_params = [{transform_indices = @transform_0, window_bounds = array<i64: 8, 128>}, {transform_indices = @transform_1, window_bounds = array<i64: 8, 128>}, {transform_indices = @transform_2, window_bounds = array<i64: 24, 128>}, {transform_indices = @transform_3, window_bounds = array<i64: 24, 128>}, {transform_indices = @transform_4, window_bounds = array<i64: 24, 128>}, {transform_indices = @transform_5, window_bounds = array<i64: 24, 128>}, {transform_indices = @transform_6, window_bounds = array<i64: 24, 128>}, {transform_indices = @transform_7, window_bounds = array<i64: 24, 128>}, {transform_indices = @transform_8, window_bounds = array<i64: 24, 128>}, {pipeline_mode = #tpu.pipeline_mode<synchronous>, transform_indices = @transform_9, window_bounds = array<i64: 8, 128>}, {pipeline_mode = #tpu.pipeline_mode<synchronous>, transform_indices = @transform_10, window_bounds = array<i64: 8, 128>}, {pipeline_mode = #tpu.pipeline_mode<synchronous>, transform_indices = @transform_11, window_bounds = array<i64: 8, 128>}, {pipeline_mode = #tpu.pipeline_mode<synchronous>, transform_indices = @transform_12, window_bounds = array<i64: 8, 128>}, {pipeline_mode = #tpu.pipeline_mode<synchronous>, transform_indices = @transform_13, window_bounds = array<i64: 8, 128>}, {pipeline_mode = #tpu.pipeline_mode<synchronous>, transform_indices = @transform_14, window_bounds = array<i64: 8, 128>}, {pipeline_mode = #tpu.pipeline_mode<synchronous>, transform_indices = @transform_15, window_bounds = array<i64: 88, 128>}, {pipeline_mode = #tpu.pipeline_mode<synchronous>, transform_indices = @transform_16, window_bounds = array<i64: 88, 128>}, {pipeline_mode = #tpu.pipeline_mode<synchronous>, transform_indices = @transform_17, window_bounds = array<i64: 104, 256>}, {pipeline_mode = #tpu.pipeline_mode<synchronous>, transform_indices = @transform_18, window_bounds = array<i64: 104, 256>}, {pipeline_mode = #tpu.pipeline_mode<synchronous>, transform_indices = @transform_19, window_bounds = array<i64: 1, 256>}, {pipeline_mode = #tpu.pipeline_mode<synchronous>, transform_indices = @transform_20, window_bounds = array<i64: 8, 128>}, {pipeline_mode = #tpu.pipeline_mode<synchronous>, transform_indices = @transform_21, window_bounds = array<i64: 8, 128>}, {pipeline_mode = #tpu.pipeline_mode<synchronous>, transform_indices = @transform_22, window_bounds = array<i64: 1, 128>}]} {
    %c0_i32 = arith.constant 0 : i32
    %0 = arith.cmpi eq, %arg0, %c0_i32 : i32
    %1 = arith.extui %0 : i1 to i32
    %c0_i32_0 = arith.constant 0 : i32
    %2 = arith.cmpi ne, %1, %c0_i32_0 : i32
    scf.if %2 {
      %cst_35 = arith.constant 0.000000e+00 : f32
      %49 = vector.broadcast %cst_35 : f32 to vector<8x128xf32>
      %c0_36 = arith.constant 0 : index
      %c0_37 = arith.constant 0 : index
      %50 = vector.load %arg24[%c0_36, %c0_37] : memref<8x128xf32, #tpu.memory_space<vmem>>, vector<8x128xf32>
      tpu.vector_store %arg24[%c0_36, %c0_37], %49 {strides = array<i32>} : memref<8x128xf32, #tpu.memory_space<vmem>>, vector<8x128xf32>,
      %cst_38 = arith.constant 0.000000e+00 : f32
      %51 = vector.broadcast %cst_38 : f32 to vector<24x128xf32>
      %c0_39 = arith.constant 0 : index
      %c0_40 = arith.constant 0 : index
      %52 = vector.load %arg25[%c0_39, %c0_40] : memref<24x128xf32, #tpu.memory_space<vmem>>, vector<24x128xf32>
      tpu.vector_store %arg25[%c0_39, %c0_40], %51 {strides = array<i32>} : memref<24x128xf32, #tpu.memory_space<vmem>>, vector<24x128xf32>,
      %cst_41 = arith.constant 0.000000e+00 : f32
      %53 = vector.broadcast %cst_41 : f32 to vector<24x128xf32>
      %c0_42 = arith.constant 0 : index
      %c0_43 = arith.constant 0 : index
      %54 = vector.load %arg26[%c0_42, %c0_43] : memref<24x128xf32, #tpu.memory_space<vmem>>, vector<24x128xf32>
      tpu.vector_store %arg26[%c0_42, %c0_43], %53 {strides = array<i32>} : memref<24x128xf32, #tpu.memory_space<vmem>>, vector<24x128xf32>,
    } else {
    }
    %c0 = arith.constant 0 : index
    %c0_1 = arith.constant 0 : index
    %3 = vector.load %arg24[%c0, %c0_1] : memref<8x128xf32, #tpu.memory_space<vmem>>, vector<8x128xf32>
    %c0_2 = arith.constant 0 : index
    %c0_3 = arith.constant 0 : index
    %4 = vector.load %arg1[%c0_2, %c0_3] : memref<8x128xf32, #tpu.memory_space<vmem>>, vector<8x128xf32>
    %c0_4 = arith.constant 0 : index
    %c0_5 = arith.constant 0 : index
    %5 = vector.load %arg2[%c0_4, %c0_5] : memref<8x128xf32, #tpu.memory_space<vmem>>, vector<8x128xf32>
    %6 = arith.subf %4, %5 : vector<8x128xf32>
    %7 = math.absf %6 : vector<8x128xf32>
    %8 = arith.addf %3, %7 : vector<8x128xf32>
    %c0_6 = arith.constant 0 : index
    %c0_7 = arith.constant 0 : index
    %9 = vector.load %arg24[%c0_6, %c0_7] : memref<8x128xf32, #tpu.memory_space<vmem>>, vector<8x128xf32>
    tpu.vector_store %arg24[%c0_6, %c0_7], %8 {strides = array<i32>} : memref<8x128xf32, #tpu.memory_space<vmem>>, vector<8x128xf32>,
    %c0_8 = arith.constant 0 : index
    %c0_9 = arith.constant 0 : index
    %10 = vector.load %arg25[%c0_8, %c0_9] : memref<24x128xf32, #tpu.memory_space<vmem>>, vector<24x128xf32>
    %c0_10 = arith.constant 0 : index
    %c0_11 = arith.constant 0 : index
    %11 = vector.load %arg3[%c0_10, %c0_11] : memref<24x128xf32, #tpu.memory_space<vmem>>, vector<24x128xf32>
    %c0_12 = arith.constant 0 : index
    %c0_13 = arith.constant 0 : index
    %12 = vector.load %arg4[%c0_12, %c0_13] : memref<24x128xf32, #tpu.memory_space<vmem>>, vector<24x128xf32>
    %13 = arith.subf %11, %12 : vector<24x128xf32>
    %14 = math.absf %13 : vector<24x128xf32>
    %15 = arith.addf %10, %14 : vector<24x128xf32>
    %c0_14 = arith.constant 0 : index
    %c0_15 = arith.constant 0 : index
    %16 = vector.load %arg25[%c0_14, %c0_15] : memref<24x128xf32, #tpu.memory_space<vmem>>, vector<24x128xf32>
    tpu.vector_store %arg25[%c0_14, %c0_15], %15 {strides = array<i32>} : memref<24x128xf32, #tpu.memory_space<vmem>>, vector<24x128xf32>,
    %c0_16 = arith.constant 0 : index
    %c0_17 = arith.constant 0 : index
    %17 = vector.load %arg5[%c0_16, %c0_17] : memref<24x128xf32, #tpu.memory_space<vmem>>, vector<24x128xf32>
    %c0_18 = arith.constant 0 : index
    %c0_19 = arith.constant 0 : index
    %18 = vector.load %arg6[%c0_18, %c0_19] : memref<24x128xf32, #tpu.memory_space<vmem>>, vector<24x128xf32>
    %c0_20 = arith.constant 0 : index
    %c0_21 = arith.constant 0 : index
    %19 = vector.load %arg7[%c0_20, %c0_21] : memref<24x128xf32, #tpu.memory_space<vmem>>, vector<24x128xf32>
    %cst = arith.constant 1.000000e+00 : f32
    %20 = vector.broadcast %cst : f32 to vector<24x128xf32>
    %21 = arith.subf %20, %18 : vector<24x128xf32>
    %22 = arith.mulf %17, %21 : vector<24x128xf32>
    %23 = arith.addf %22, %18 : vector<24x128xf32>
    %24 = arith.mulf %23, %19 : vector<24x128xf32>
    %cst_22 = arith.constant 1.000000e+00 : f32
    %25 = vector.broadcast %cst_22 : f32 to vector<24x128xf32>
    %26 = arith.subf %25, %19 : vector<24x128xf32>
    %27 = arith.addf %24, %26 : vector<24x128xf32>
    %28 = arith.mulf %17, %18 : vector<24x128xf32>
    %cst_23 = arith.constant 1.000000e+00 : f32
    %29 = vector.broadcast %cst_23 : f32 to vector<24x128xf32>
    %30 = arith.subf %29, %18 : vector<24x128xf32>
    %31 = arith.addf %28, %30 : vector<24x128xf32>
    %32 = arith.mulf %31, %19 : vector<24x128xf32>
    %cst_24 = arith.constant 1.000000e+00 : f32
    %33 = vector.broadcast %cst_24 : f32 to vector<24x128xf32>
    %34 = arith.subf %33, %19 : vector<24x128xf32>
    %35 = arith.addf %32, %34 : vector<24x128xf32>
    %c0_25 = arith.constant 0 : index
    %c0_26 = arith.constant 0 : index
    %36 = vector.load %arg26[%c0_25, %c0_26] : memref<24x128xf32, #tpu.memory_space<vmem>>, vector<24x128xf32>
    %c0_27 = arith.constant 0 : index
    %c0_28 = arith.constant 0 : index
    %37 = vector.load %arg8[%c0_27, %c0_28] : memref<24x128xf32, #tpu.memory_space<vmem>>, vector<24x128xf32>
    %38 = arith.subf %27, %37 : vector<24x128xf32>
    %39 = math.absf %38 : vector<24x128xf32>
    %c0_29 = arith.constant 0 : index
    %c0_30 = arith.constant 0 : index
    %40 = vector.load %arg9[%c0_29, %c0_30] : memref<24x128xf32, #tpu.memory_space<vmem>>, vector<24x128xf32>
    %41 = arith.subf %35, %40 : vector<24x128xf32>
    %42 = math.absf %41 : vector<24x128xf32>
    %43 = arith.addf %39, %42 : vector<24x128xf32>
    %44 = arith.addf %36, %43 : vector<24x128xf32>
    %c0_31 = arith.constant 0 : index
    %c0_32 = arith.constant 0 : index
    %45 = vector.load %arg26[%c0_31, %c0_32] : memref<24x128xf32, #tpu.memory_space<vmem>>, vector<24x128xf32>
    tpu.vector_store %arg26[%c0_31, %c0_32], %44 {strides = array<i32>} : memref<24x128xf32, #tpu.memory_space<vmem>>, vector<24x128xf32>,
    %c0_i32_33 = arith.constant 0 : i32
    %46 = arith.cmpi eq, %arg0, %c0_i32_33 : i32
    %47 = arith.extui %46 : i1 to i32
    %c0_i32_34 = arith.constant 0 : i32
    %48 = arith.cmpi ne, %47, %c0_i32_34 : i32
    scf.if %48 {
      %c0_35 = arith.constant 0 : index
      %c0_36 = arith.constant 0 : index
      %49 = vector.load %arg24[%c0_35, %c0_36] : memref<8x128xf32, #tpu.memory_space<vmem>>, vector<8x128xf32>
      %50 = vector.shape_cast %49 : vector<8x128xf32> to vector<1x8x128xf32>
      %cst_37 = arith.constant dense<0.000000e+00> : vector<1xf32>
      %51 = vector.multi_reduction <add>, %50, %cst_37 [1, 2] : vector<1x8x128xf32> to vector<1xf32>
      %52 = vector.shape_cast %51 : vector<1xf32> to vector<1x1x1xf32>
      %53 = vector.extract %52[0, 0, 0] : f32 from vector<1x1x1xf32>
      %cst_38 = arith.constant 1.000000e-03 : f32
      %54 = arith.mulf %53, %cst_38 : f32
      %c0_39 = arith.constant 0 : index
      %c0_40 = arith.constant 0 : index
      %55 = vector.load %arg25[%c0_39, %c0_40] : memref<24x128xf32, #tpu.memory_space<vmem>>, vector<24x128xf32>
      %56 = vector.shape_cast %55 : vector<24x128xf32> to vector<1x24x128xf32>
      %cst_41 = arith.constant dense<0.000000e+00> : vector<1xf32>
      %57 = vector.multi_reduction <add>, %56, %cst_41 [1, 2] : vector<1x24x128xf32> to vector<1xf32>
      %58 = vector.shape_cast %57 : vector<1xf32> to vector<1x1x1xf32>
      %59 = vector.extract %58[0, 0, 0] : f32 from vector<1x1x1xf32>
      %cst_42 = arith.constant 3.3333333E-4 : f32
      %60 = arith.mulf %59, %cst_42 : f32
      %c0_43 = arith.constant 0 : index
      %c0_44 = arith.constant 0 : index
      %61 = vector.load %arg26[%c0_43, %c0_44] : memref<24x128xf32, #tpu.memory_space<vmem>>, vector<24x128xf32>
      %62 = vector.shape_cast %61 : vector<24x128xf32> to vector<1x24x128xf32>
      %cst_45 = arith.constant dense<0.000000e+00> : vector<1xf32>
      %63 = vector.multi_reduction <add>, %62, %cst_45 [1, 2] : vector<1x24x128xf32> to vector<1xf32>
      %64 = vector.shape_cast %63 : vector<1xf32> to vector<1x1x1xf32>
      %65 = vector.extract %64[0, 0, 0] : f32 from vector<1x1x1xf32>
      %cst_46 = arith.constant 3.3333333E-4 : f32
      %66 = arith.mulf %65, %cst_46 : f32
      %c0_47 = arith.constant 0 : index
      %c0_48 = arith.constant 0 : index
      %67 = vector.load %arg10[%c0_47, %c0_48] : memref<8x128xf32, #tpu.memory_space<vmem>>, vector<8x128xf32>
      %68 = arith.mulf %67, %67 : vector<8x128xf32>
      %69 = vector.shape_cast %68 : vector<8x128xf32> to vector<1x8x128xf32>
      %cst_49 = arith.constant dense<0.000000e+00> : vector<1xf32>
      %70 = vector.multi_reduction <add>, %69, %cst_49 [1, 2] : vector<1x8x128xf32> to vector<1xf32>
      %71 = vector.shape_cast %70 : vector<1xf32> to vector<1x1x1xf32>
      %72 = vector.extract %71[0, 0, 0] : f32 from vector<1x1x1xf32>
      %cst_50 = arith.constant 5.000000e-03 : f32
      %73 = arith.mulf %72, %cst_50 : f32
      %c0_51 = arith.constant 0 : index
      %c0_52 = arith.constant 0 : index
      %74 = vector.load %arg11[%c0_51, %c0_52] : memref<8x128xf32, #tpu.memory_space<vmem>>, vector<8x128xf32>
      %c0_53 = arith.constant 0 : index
      %c0_54 = arith.constant 0 : index
      %75 = vector.load %arg12[%c0_53, %c0_54] : memref<8x128xf32, #tpu.memory_space<vmem>>, vector<8x128xf32>
      %c0_55 = arith.constant 0 : index
      %c0_56 = arith.constant 0 : index
      %76 = vector.load %arg13[%c0_55, %c0_56] : memref<8x128xf32, #tpu.memory_space<vmem>>, vector<8x128xf32>
      %77 = arith.mulf %74, %74 : vector<8x128xf32>
      %78 = arith.mulf %75, %75 : vector<8x128xf32>
      %79 = arith.addf %77, %78 : vector<8x128xf32>
      %80 = arith.mulf %76, %76 : vector<8x128xf32>
      %81 = arith.addf %79, %80 : vector<8x128xf32>
      %82 = math.sqrt %81 : vector<8x128xf32>
      %cst_57 = arith.constant 1.000000e+00 : f32
      %83 = vector.broadcast %cst_57 : f32 to vector<8x128xf32>
      %84 = arith.subf %82, %83 : vector<8x128xf32>
      %85 = arith.mulf %84, %84 : vector<8x128xf32>
      %86 = vector.shape_cast %85 : vector<8x128xf32> to vector<1x8x128xf32>
      %cst_58 = arith.constant dense<0.000000e+00> : vector<1xf32>
      %87 = vector.multi_reduction <add>, %86, %cst_58 [1, 2] : vector<1x8x128xf32> to vector<1xf32>
      %88 = vector.shape_cast %87 : vector<1xf32> to vector<1x1x1xf32>
      %89 = vector.extract %88[0, 0, 0] : f32 from vector<1x1x1xf32>
      %cst_59 = arith.constant 5.000000e-03 : f32
      %90 = arith.mulf %89, %cst_59 : f32
      %c0_60 = arith.constant 0 : index
      %c0_61 = arith.constant 0 : index
      %91 = vector.load %arg14[%c0_60, %c0_61] : memref<8x128xf32, #tpu.memory_space<vmem>>, vector<8x128xf32>
      %c0_62 = arith.constant 0 : index
      %c0_63 = arith.constant 0 : index
      %92 = vector.load %arg15[%c0_62, %c0_63] : memref<8x128xf32, #tpu.memory_space<vmem>>, vector<8x128xf32>
      %93 = arith.subf %91, %92 : vector<8x128xf32>
      %94 = arith.mulf %93, %93 : vector<8x128xf32>
      %95 = vector.shape_cast %94 : vector<8x128xf32> to vector<1x8x128xf32>
      %cst_64 = arith.constant dense<0.000000e+00> : vector<1xf32>
      %96 = vector.multi_reduction <add>, %95, %cst_64 [1, 2] : vector<1x8x128xf32> to vector<1xf32>
      %97 = vector.shape_cast %96 : vector<1xf32> to vector<1x1x1xf32>
      %98 = vector.extract %97[0, 0, 0] : f32 from vector<1x1x1xf32>
      %cst_65 = arith.constant 0.00166666671 : f32
      %99 = arith.mulf %98, %cst_65 : f32
      %c0_66 = arith.constant 0 : index
      %c0_67 = arith.constant 0 : index
      %100 = vector.load %arg16[%c0_66, %c0_67] : memref<88x128xf32, #tpu.memory_space<vmem>>, vector<88x128xf32>
      %c0_68 = arith.constant 0 : index
      %c0_69 = arith.constant 0 : index
      %101 = vector.load %arg17[%c0_68, %c0_69] : memref<88x128xf32, #tpu.memory_space<vmem>>, vector<88x128xf32>
      %102 = arith.subf %100, %101 : vector<88x128xf32>
      %103 = arith.mulf %102, %102 : vector<88x128xf32>
      %104 = vector.shape_cast %103 : vector<88x128xf32> to vector<1x88x128xf32>
      %cst_70 = arith.constant dense<0.000000e+00> : vector<1xf32>
      %105 = vector.multi_reduction <add>, %104, %cst_70 [1, 2] : vector<1x88x128xf32> to vector<1xf32>
      %106 = vector.shape_cast %105 : vector<1xf32> to vector<1x1x1xf32>
      %107 = vector.extract %106[0, 0, 0] : f32 from vector<1x1x1xf32>
      %cst_71 = arith.constant 0.00925925932 : f32
      %108 = arith.mulf %107, %cst_71 : f32
      %c0_72 = arith.constant 0 : index
      %c0_73 = arith.constant 0 : index
      %109 = vector.load %arg18[%c0_72, %c0_73] : memref<104x256xf32, #tpu.memory_space<vmem>>, vector<104x256xf32>
      %c0_74 = arith.constant 0 : index
      %c0_75 = arith.constant 0 : index
      %110 = vector.load %arg19[%c0_74, %c0_75] : memref<104x256xf32, #tpu.memory_space<vmem>>, vector<104x256xf32>
      %111 = arith.subf %109, %110 : vector<104x256xf32>
      %112 = arith.mulf %111, %111 : vector<104x256xf32>
      %c0_76 = arith.constant 0 : index
      %c0_77 = arith.constant 0 : index
      %113 = vector.load %arg20[%c0_76, %c0_77] : memref<1x256xf32, #tpu.memory_space<vmem>>, vector<1x256xf32>
      %114 = vector.broadcast %113 : vector<1x256xf32> to vector<104x256xf32>
      %115 = arith.mulf %112, %114 : vector<104x256xf32>
      %116 = vector.shape_cast %115 : vector<104x256xf32> to vector<1x104x256xf32>
      %cst_78 = arith.constant dense<0.000000e+00> : vector<1xf32>
      %117 = vector.multi_reduction <add>, %116, %cst_78 [1, 2] : vector<1x104x256xf32> to vector<1xf32>
      %118 = vector.shape_cast %117 : vector<1xf32> to vector<1x1x1xf32>
      %119 = vector.extract %118[0, 0, 0] : f32 from vector<1x1x1xf32>
      %cst_79 = arith.constant 6.66666674E-5 : f32
      %120 = arith.mulf %119, %cst_79 : f32
      %c0_80 = arith.constant 0 : index
      %c0_81 = arith.constant 0 : index
      %121 = vector.load %arg21[%c0_80, %c0_81] : memref<8x128xf32, #tpu.memory_space<vmem>>, vector<8x128xf32>
      %122 = arith.mulf %121, %121 : vector<8x128xf32>
      %123 = vector.shape_cast %122 : vector<8x128xf32> to vector<1x8x128xf32>
      %cst_82 = arith.constant dense<0.000000e+00> : vector<1xf32>
      %124 = vector.multi_reduction <add>, %123, %cst_82 [1, 2] : vector<1x8x128xf32> to vector<1xf32>
      %125 = vector.shape_cast %124 : vector<1xf32> to vector<1x1x1xf32>
      %126 = vector.extract %125[0, 0, 0] : f32 from vector<1x1x1xf32>
      %cst_83 = arith.constant 0.00333333341 : f32
      %127 = arith.mulf %126, %cst_83 : f32
      %c0_84 = arith.constant 0 : index
      %c0_85 = arith.constant 0 : index
      %128 = vector.load %arg22[%c0_84, %c0_85] : memref<8x128xf32, #tpu.memory_space<vmem>>, vector<8x128xf32>
      %129 = arith.mulf %128, %128 : vector<8x128xf32>
      %130 = vector.shape_cast %129 : vector<8x128xf32> to vector<1x8x128xf32>
      %cst_86 = arith.constant dense<0.000000e+00> : vector<1xf32>
      %131 = vector.multi_reduction <add>, %130, %cst_86 [1, 2] : vector<1x8x128xf32> to vector<1xf32>
      %132 = vector.shape_cast %131 : vector<1xf32> to vector<1x1x1xf32>
      %133 = vector.extract %132[0, 0, 0] : f32 from vector<1x1x1xf32>
      %cst_87 = arith.constant 3.125000e-02 : f32
      %134 = arith.mulf %133, %cst_87 : f32
      %cst_88 = arith.constant 1.000000e+00 : f32
      %135 = arith.mulf %60, %cst_88 : f32
      %cst_89 = arith.constant 0.000000e+00 : f32
      %136 = arith.addf %cst_89, %135 : f32
      %cst_90 = arith.constant 1.000000e+00 : f32
      %137 = arith.mulf %54, %cst_90 : f32
      %138 = arith.addf %136, %137 : f32
      %cst_91 = arith.constant 5.000000e-01 : f32
      %139 = arith.mulf %66, %cst_91 : f32
      %140 = arith.addf %138, %139 : f32
      %cst_92 = arith.constant 1.000000e-01 : f32
      %141 = arith.mulf %73, %cst_92 : f32
      %142 = arith.addf %140, %141 : f32
      %cst_93 = arith.constant 1.000000e-01 : f32
      %143 = arith.mulf %90, %cst_93 : f32
      %144 = arith.addf %142, %143 : f32
      %cst_94 = arith.constant 1.000000e-01 : f32
      %145 = arith.mulf %99, %cst_94 : f32
      %146 = arith.addf %144, %145 : f32
      %cst_95 = arith.constant 1.000000e+01 : f32
      %147 = arith.mulf %108, %cst_95 : f32
      %148 = arith.addf %146, %147 : f32
      %cst_96 = arith.constant 1.000000e+01 : f32
      %149 = arith.mulf %120, %cst_96 : f32
      %150 = arith.addf %148, %149 : f32
      %cst_97 = arith.constant 0.00999999977 : f32
      %151 = arith.mulf %127, %cst_97 : f32
      %152 = arith.addf %150, %151 : f32
      %cst_98 = arith.constant 0.00999999977 : f32
      %153 = arith.mulf %134, %cst_98 : f32
      %154 = arith.addf %152, %153 : f32
      %155 = tpu.iota {dimensions = array<i32: 1>} : vector<1x128xi32>
      %cst_99 = arith.constant 0.000000e+00 : f32
      %156 = vector.broadcast %cst_99 : f32 to vector<1x128xf32>
      %c2_i32 = arith.constant 2 : i32
      %157 = vector.broadcast %c2_i32 : i32 to vector<1x128xi32>
      %158 = arith.cmpi eq, %155, %157 : vector<1x128xi32>
      %159 = vector.broadcast %54 : f32 to vector<1x128xf32>
      %160 = arith.select %158, %159, %156 : vector<1x128xi1>, vector<1x128xf32>
      %c1_i32 = arith.constant 1 : i32
      %161 = vector.broadcast %c1_i32 : i32 to vector<1x128xi32>
      %162 = arith.cmpi eq, %155, %161 : vector<1x128xi32>
      %163 = vector.broadcast %60 : f32 to vector<1x128xf32>
      %164 = arith.select %162, %163, %160 : vector<1x128xi1>, vector<1x128xf32>
      %c10_i32 = arith.constant 10 : i32
      %165 = vector.broadcast %c10_i32 : i32 to vector<1x128xi32>
      %166 = arith.cmpi eq, %155, %165 : vector<1x128xi32>
      %167 = vector.broadcast %66 : f32 to vector<1x128xf32>
      %168 = arith.select %166, %167, %164 : vector<1x128xi1>, vector<1x128xf32>
      %c3_i32 = arith.constant 3 : i32
      %169 = vector.broadcast %c3_i32 : i32 to vector<1x128xi32>
      %170 = arith.cmpi eq, %155, %169 : vector<1x128xi32>
      %171 = vector.broadcast %73 : f32 to vector<1x128xf32>
      %172 = arith.select %170, %171, %168 : vector<1x128xi1>, vector<1x128xf32>
      %c4_i32 = arith.constant 4 : i32
      %173 = vector.broadcast %c4_i32 : i32 to vector<1x128xi32>
      %174 = arith.cmpi eq, %155, %173 : vector<1x128xi32>
      %175 = vector.broadcast %90 : f32 to vector<1x128xf32>
      %176 = arith.select %174, %175, %172 : vector<1x128xi1>, vector<1x128xf32>
      %c5_i32 = arith.constant 5 : i32
      %177 = vector.broadcast %c5_i32 : i32 to vector<1x128xi32>
      %178 = arith.cmpi eq, %155, %177 : vector<1x128xi32>
      %179 = vector.broadcast %99 : f32 to vector<1x128xf32>
      %180 = arith.select %178, %179, %176 : vector<1x128xi1>, vector<1x128xf32>
      %c6_i32 = arith.constant 6 : i32
      %181 = vector.broadcast %c6_i32 : i32 to vector<1x128xi32>
      %182 = arith.cmpi eq, %155, %181 : vector<1x128xi32>
      %183 = vector.broadcast %108 : f32 to vector<1x128xf32>
      %184 = arith.select %182, %183, %180 : vector<1x128xi1>, vector<1x128xf32>
      %c7_i32 = arith.constant 7 : i32
      %185 = vector.broadcast %c7_i32 : i32 to vector<1x128xi32>
      %186 = arith.cmpi eq, %155, %185 : vector<1x128xi32>
      %187 = vector.broadcast %120 : f32 to vector<1x128xf32>
      %188 = arith.select %186, %187, %184 : vector<1x128xi1>, vector<1x128xf32>
      %c8_i32 = arith.constant 8 : i32
      %189 = vector.broadcast %c8_i32 : i32 to vector<1x128xi32>
      %190 = arith.cmpi eq, %155, %189 : vector<1x128xi32>
      %191 = vector.broadcast %127 : f32 to vector<1x128xf32>
      %192 = arith.select %190, %191, %188 : vector<1x128xi1>, vector<1x128xf32>
      %c9_i32 = arith.constant 9 : i32
      %193 = vector.broadcast %c9_i32 : i32 to vector<1x128xi32>
      %194 = arith.cmpi eq, %155, %193 : vector<1x128xi32>
      %195 = vector.broadcast %134 : f32 to vector<1x128xf32>
      %196 = arith.select %194, %195, %192 : vector<1x128xi1>, vector<1x128xf32>
      %c0_i32_100 = arith.constant 0 : i32
      %197 = vector.broadcast %c0_i32_100 : i32 to vector<1x128xi32>
      %198 = arith.cmpi eq, %155, %197 : vector<1x128xi32>
      %199 = vector.broadcast %154 : f32 to vector<1x128xf32>
      %200 = arith.select %198, %199, %196 : vector<1x128xi1>, vector<1x128xf32>
      %c0_101 = arith.constant 0 : index
      %c0_102 = arith.constant 0 : index
      %201 = vector.load %arg23[%c0_101, %c0_102] : memref<1x128xf32, #tpu.memory_space<vmem>>, vector<1x128xf32>
      tpu.vector_store %arg23[%c0_101, %c0_102], %200 {strides = array<i32>} : memref<1x128xf32, #tpu.memory_space<vmem>>, vector<1x128xf32>,
    } else {
    }
    return
  }
  func.func @transform_0(%arg0: i32) -> (i32, i32) {
    %c0_i32 = arith.constant 0 : i32
    %c0_i32_0 = arith.constant 0 : i32
    return %arg0, %c0_i32 : i32, i32
  }
  func.func @transform_1(%arg0: i32) -> (i32, i32) {
    %c0_i32 = arith.constant 0 : i32
    %c0_i32_0 = arith.constant 0 : i32
    return %arg0, %c0_i32 : i32, i32
  }
  func.func @transform_2(%arg0: i32) -> (i32, i32) {
    %c0_i32 = arith.constant 0 : i32
    %c0_i32_0 = arith.constant 0 : i32
    return %arg0, %c0_i32 : i32, i32
  }
  func.func @transform_3(%arg0: i32) -> (i32, i32) {
    %c0_i32 = arith.constant 0 : i32
    %c0_i32_0 = arith.constant 0 : i32
    return %arg0, %c0_i32 : i32, i32
  }
  func.func @transform_4(%arg0: i32) -> (i32, i32) {
    %c0_i32 = arith.constant 0 : i32
    %c0_i32_0 = arith.constant 0 : i32
    return %arg0, %c0_i32 : i32, i32
  }
  func.func @transform_5(%arg0: i32) -> (i32, i32) {
    %c0_i32 = arith.constant 0 : i32
    %c0_i32_0 = arith.constant 0 : i32
    return %arg0, %c0_i32 : i32, i32
  }
  func.func @transform_6(%arg0: i32) -> (i32, i32) {
    %c0_i32 = arith.constant 0 : i32
    %c0_i32_0 = arith.constant 0 : i32
    return %arg0, %c0_i32 : i32, i32
  }
  func.func @transform_7(%arg0: i32) -> (i32, i32) {
    %c0_i32 = arith.constant 0 : i32
    %c0_i32_0 = arith.constant 0 : i32
    return %arg0, %c0_i32 : i32, i32
  }
  func.func @transform_8(%arg0: i32) -> (i32, i32) {
    %c0_i32 = arith.constant 0 : i32
    %c0_i32_0 = arith.constant 0 : i32
    return %arg0, %c0_i32 : i32, i32
  }
  func.func @transform_9(%arg0: i32) -> (i32, i32) {
    %c0_i32 = arith.constant 0 : i32
    %c0_i32_0 = arith.constant 0 : i32
    %c0_i32_1 = arith.constant 0 : i32
    return %c0_i32, %c0_i32_0 : i32, i32
  }
  func.func @transform_10(%arg0: i32) -> (i32, i32) {
    %c0_i32 = arith.constant 0 : i32
    %c0_i32_0 = arith.constant 0 : i32
    %c0_i32_1 = arith.constant 0 : i32
    return %c0_i32, %c0_i32_0 : i32, i32
  }
  func.func @transform_11(%arg0: i32) -> (i32, i32) {
    %c0_i32 = arith.constant 0 : i32
    %c0_i32_0 = arith.constant 0 : i32
    %c0_i32_1 = arith.constant 0 : i32
    return %c0_i32, %c0_i32_0 : i32, i32
  }
  func.func @transform_12(%arg0: i32) -> (i32, i32) {
    %c0_i32 = arith.constant 0 : i32
    %c0_i32_0 = arith.constant 0 : i32
    %c0_i32_1 = arith.constant 0 : i32
    return %c0_i32, %c0_i32_0 : i32, i32
  }
  func.func @transform_13(%arg0: i32) -> (i32, i32) {
    %c0_i32 = arith.constant 0 : i32
    %c0_i32_0 = arith.constant 0 : i32
    %c0_i32_1 = arith.constant 0 : i32
    return %c0_i32, %c0_i32_0 : i32, i32
  }
  func.func @transform_14(%arg0: i32) -> (i32, i32) {
    %c0_i32 = arith.constant 0 : i32
    %c0_i32_0 = arith.constant 0 : i32
    %c0_i32_1 = arith.constant 0 : i32
    return %c0_i32, %c0_i32_0 : i32, i32
  }
  func.func @transform_15(%arg0: i32) -> (i32, i32) {
    %c0_i32 = arith.constant 0 : i32
    %c0_i32_0 = arith.constant 0 : i32
    %c0_i32_1 = arith.constant 0 : i32
    return %c0_i32, %c0_i32_0 : i32, i32
  }
  func.func @transform_16(%arg0: i32) -> (i32, i32) {
    %c0_i32 = arith.constant 0 : i32
    %c0_i32_0 = arith.constant 0 : i32
    %c0_i32_1 = arith.constant 0 : i32
    return %c0_i32, %c0_i32_0 : i32, i32
  }
  func.func @transform_17(%arg0: i32) -> (i32, i32) {
    %c0_i32 = arith.constant 0 : i32
    %c0_i32_0 = arith.constant 0 : i32
    %c0_i32_1 = arith.constant 0 : i32
    return %c0_i32, %c0_i32_0 : i32, i32
  }
  func.func @transform_18(%arg0: i32) -> (i32, i32) {
    %c0_i32 = arith.constant 0 : i32
    %c0_i32_0 = arith.constant 0 : i32
    %c0_i32_1 = arith.constant 0 : i32
    return %c0_i32, %c0_i32_0 : i32, i32
  }
  func.func @transform_19(%arg0: i32) -> (i32, i32) {
    %c0_i32 = arith.constant 0 : i32
    %c0_i32_0 = arith.constant 0 : i32
    %c0_i32_1 = arith.constant 0 : i32
    return %c0_i32, %c0_i32_0 : i32, i32
  }
  func.func @transform_20(%arg0: i32) -> (i32, i32) {
    %c0_i32 = arith.constant 0 : i32
    %c0_i32_0 = arith.constant 0 : i32
    %c0_i32_1 = arith.constant 0 : i32
    return %c0_i32, %c0_i32_0 : i32, i32
  }
  func.func @transform_21(%arg0: i32) -> (i32, i32) {
    %c0_i32 = arith.constant 0 : i32
    %c0_i32_0 = arith.constant 0 : i32
    %c0_i32_1 = arith.constant 0 : i32
    return %c0_i32, %c0_i32_0 : i32, i32
  }
  func.func @transform_22(%arg0: i32) -> (i32, i32) {
    %c0_i32 = arith.constant 0 : i32
    %c0_i32_0 = arith.constant 0 : i32
    %c0_i32_1 = arith.constant 0 : i32
    return %c0_i32, %c0_i32_0 : i32, i32
  }
}

</mosaic_0001>

<bundles_post_ra>
// kernel: tpu_custom_call.1
= control target key start
LH: loop header
LB: loop body
LE: loop exit
PB: predicated region body
PF: predicated region fallthrough
CT: control target
= control target key end

     0   :  { %s1653_s0 = inlined_call_operand.hbm [shape: f32[8,128], index: 0, kind: input, shape index: {}]   ;;  %s1654_s1 = inlined_call_operand.hbm [shape: f32[8,128], index: 1, kind: input, shape index: {}]   ;;  %s1655_s2 = inlined_call_operand.hbm [shape: f32[24,128], index: 2, kind: input, shape index: {}]   ;;  %s1656_s3 = inlined_call_operand.hbm [shape: f32[24,128], index: 3, kind: input, shape index: {}]   ;;  %s1657_s4 = inlined_call_operand.hbm [shape: f32[24,128], index: 4, kind: input, shape index: {}]   ;;  %s1658_s5 = inlined_call_operand.hbm [shape: f32[24,128], index: 5, kind: input, shape index: {}]   ;;  %s1659_s6 = inlined_call_operand.hbm [shape: f32[24,128], index: 6, kind: input, shape index: {}]   ;;  %s1660_s7 = inlined_call_operand.vmem [shape: f32[24,128], index: 7, kind: input, shape index: {}]   ;;  %s1661_s8 = inlined_call_operand.hbm [shape: f32[24,128], index: 8, kind: input, shape index: {}]   ;;  %s1662_s9 = inlined_call_operand.vmem [shape: f32[8,128], index: 9, kind: input, shape index: {}]   ;;  %s1663_s10 = inlined_call_operand.hbm [shape: f32[8,128], index: 10, kind: input, shape index: {}]   ;;  %s1664_s11 = inlined_call_operand.vmem [shape: f32[8,128], index: 11, kind: input, shape index: {}]   ;;  %s1665_s12 = inlined_call_operand.hbm [shape: f32[8,128], index: 12, kind: input, shape index: {}]   ;;  %s1666_s13 = inlined_call_operand.vmem [shape: f32[8,128], index: 13, kind: input, shape index: {}]   ;;  %s1667_s14 = inlined_call_operand.hbm [shape: f32[8,128], index: 14, kind: input, shape index: {}]   ;;  %s1668_s15 = inlined_call_operand.hbm [shape: f32[88,128], index: 15, kind: input, shape index: {}]   ;;  %s1669_s16 = inlined_call_operand.hbm [shape: f32[88,128], index: 16, kind: input, shape index: {}]   ;;  %s1670_s17 = inlined_call_operand.hbm [shape: f32[104,256], index: 17, kind: input, shape index: {}]   ;;  %s1671_s18 = inlined_call_operand.hbm [shape: f32[104,256], index: 18, kind: input, shape index: {}]   ;;  %s1672_s19 = inlined_call_operand.vmem [shape: f32[1,256], index: 19, kind: input, shape index: {}]   ;;  %s1673_s20 = inlined_call_operand.vmem [shape: f32[8,128], index: 20, kind: input, shape index: {}]   ;;  %s1674_s21 = inlined_call_operand.vmem [shape: f32[8,128], index: 21, kind: input, shape index: {}]   ;;  %s1675_s22 = inlined_call_operand.hbm [shape: f32[1,128], index: 22, kind: output, shape index: {}]  }
   0x1   :  { %1684 = sst [smem:[#allocation39_spill]] %s1653_s0 }
   0x2   :  { %1685 = sst [smem:[#allocation40_spill]] %s1654_s1 }
   0x3   :  { %1686 = sst [smem:[#allocation41_spill]] %s1655_s2 }
   0x4   :  { %1687 = sst [smem:[#allocation42_spill]] %s1656_s3 }
   0x5   :  { %1688 = sst [smem:[#allocation43_spill]] %s1657_s4 }
   0x6   :  { %1689 = sst [smem:[#allocation44_spill]] %s1658_s5 }
   0x7   :  { %1690 = sst [smem:[#allocation45_spill]] %s1659_s6 }
   0x8   :  { %1691 = sst [smem:[#allocation46_spill]] %s1674_s21 }
   0x9   :  { %1692 = sst [smem:[#allocation47_spill]] %s1675_s22 }
   0xa   :  { %27 = vsyncpa [#allocation6], 0 }
   0xb   :  { %28 = vsyncpa [#allocation9], 0 }
   0xc   :  { %29 = vsyncpa [#allocation12], 0 }
   0xd   :  { %30 = vsyncpa [#allocation15], 0 }
   0xe   :  { %31 = vsyncpa [#allocation18], 0 }
   0xf   :  { %32 = vsyncpa [#allocation21], 0 }
  0x10   :  { %33 = vsyncpa [#allocation24], 0 }
  0x11   :  { %34 = vsyncpa [#allocation27], 0 }
  0x12   :  { %35 = vsyncpa [#allocation7], 0  ;;  %s1224_s3 = smov [#allocation8]   ;;  %s1693_s4 = sld [smem:[#allocation40_spill]] }
  0x13   :  { %s52_s28 = sshll.u32 %s1224_s3, 4  ;;  %s53_s28 = int_to_ptr.vmem [resolvable:$true] %s52_s28 }
  0x18   :  { %s854_s0 = scalar_lea.hbm %s1693_s4, 128 }
  0x19   :  { %p855_p0 = scmp.ne.s32.totalorder %s1693_s4, %s854_s0  ;;  %p858_p1 = scmp.lt.u32.totalorder %s854_s0, %s1693_s4 }
  0x1b   :  { %p860_p2 = pnand %p858_p1, %p855_p0 }
  0x1d   :  { %863 = shalt.err (!%p860_p2)
}
  0x1e   :  { %s864_s6 = scalar_lea.vmem %s53_s28, 128  ;;  %p869_p4 = scmp.lt.s32.totalorder %s53_s28, %s53_s28 }
  0x1f   :  { %p865_p3 = scmp.ne.s32.totalorder %s53_s28, %s864_s6  ;;  %p870_p5 = scmp.lt.s32.totalorder %s864_s6, %s864_s6 }
  0x21   :  { %p871_p6 = por %p870_p5, %p869_p4 }
  0x23   :  { %p872_p7 = pnand %p871_p6, %p865_p3 }
  0x25   :  { %875 = shalt.err (!%p872_p7)
}
  0x26   :  { %55 = dma.hbm_to_vmem [thread:$0]  %s1693_s4, 128, %s53_s28, [#allocation9]  }
  0x27   :  { %s1225_s2 = smov [#allocation11]   ;;  %s1226_s3 = smov [#allocation14]  }
  0x28   :  { %s73_s27 = sshll.u32 %s1225_s2, 4  ;;  %s97_s29 = sshll.u32 %s1226_s3, 4  ;;  %s74_s27 = int_to_ptr.vmem [resolvable:$true] %s73_s27  ;;  %s98_s29 = int_to_ptr.vmem [resolvable:$true] %s97_s29 }
  0x29   :  { %s1694_s23 = sld [smem:[#allocation42_spill]] }
  0x2f   :  { %s876_s1 = scalar_lea.hbm %s1694_s23, 384 }
  0x30   :  { %p877_p8 = scmp.ne.s32.totalorder %s1694_s23, %s876_s1  ;;  %p880_p9 = scmp.lt.u32.totalorder %s876_s1, %s1694_s23 }
  0x32   :  { %p882_p10 = pnand %p880_p9, %p877_p8 }
  0x34   :  { %885 = shalt.err (!%p882_p10)
}
  0x35   :  { %s886_s28 = scalar_lea.vmem %s74_s27, 384  ;;  %p891_p12 = scmp.lt.s32.totalorder %s74_s27, %s74_s27 }
  0x36   :  { %p887_p11 = scmp.ne.s32.totalorder %s74_s27, %s886_s28  ;;  %p892_p13 = scmp.lt.s32.totalorder %s886_s28, %s886_s28 }
  0x38   :  { %p893_p0 = por %p892_p13, %p891_p12 }
  0x3a   :  { %p894_p1 = pnand %p893_p0, %p887_p11 }
  0x3c   :  { %897 = shalt.err (!%p894_p1)
}
  0x3d   :  { %s1227_s4 = smov 128   ;;  %s1228_s25 = smov 8  }
  0x3e   :  { %79 = dma.hbm_to_vmem [thread:$0]  %s1694_s23, 384, %s74_s27, [#allocation12], %s1227_s4, %s1227_s4, %s1228_s25  }
  0x3f   :  { %s1695_s30 = sld [smem:[#allocation44_spill]] }
  0x45   :  { %s898_s0 = scalar_lea.hbm %s1695_s30, 384 }
  0x46   :  { %p899_p2 = scmp.ne.s32.totalorder %s1695_s30, %s898_s0  ;;  %p902_p3 = scmp.lt.u32.totalorder %s898_s0, %s1695_s30 }
  0x48   :  { %p904_p4 = pnand %p902_p3, %p899_p2 }
  0x4a   :  { %907 = shalt.err (!%p904_p4)
}
  0x4b   :  { %s908_s28 = scalar_lea.vmem %s98_s29, 384  ;;  %p913_p6 = scmp.lt.s32.totalorder %s98_s29, %s98_s29 }
  0x4c   :  { %p909_p5 = scmp.ne.s32.totalorder %s98_s29, %s908_s28  ;;  %p914_p7 = scmp.lt.s32.totalorder %s908_s28, %s908_s28 }
  0x4e   :  { %p915_p8 = por %p914_p7, %p913_p6 }
  0x50   :  { %p916_p9 = pnand %p915_p8, %p909_p5 }
  0x52   :  { %919 = shalt.err (!%p916_p9)
}
  0x53   :  { %103 = dma.hbm_to_vmem [thread:$0]  %s1695_s30, 384, %s98_s29, [#allocation15], %s1227_s4, %s1227_s4, %s1228_s25  }
  0x54   :  { %s1229_s26 = smov [#allocation17]   ;;  %s1230_s22 = smov [#allocation20]  }
  0x55   :  { %s123_s2 = sshll.u32 %s1229_s26, 4  ;;  %s150_s3 = sshll.u32 %s1230_s22, 4  ;;  %s124_s2 = int_to_ptr.vmem [resolvable:$true] %s123_s2  ;;  %s151_s3 = int_to_ptr.vmem [resolvable:$true] %s150_s3 }
  0x56   :  { %s920_s5 = scalar_lea.hbm %s1661_s8, 384 }
  0x57   :  { %p921_p10 = scmp.ne.s32.totalorder %s1661_s8, %s920_s5  ;;  %p924_p11 = scmp.lt.u32.totalorder %s920_s5, %s1661_s8 }
  0x59   :  { %p926_p12 = pnand %p924_p11, %p921_p10 }
  0x5b   :  { %929 = shalt.err (!%p926_p12)
}
  0x5c   :  { %s930_s29 = scalar_lea.vmem %s124_s2, 384  ;;  %p935_p0 = scmp.lt.s32.totalorder %s124_s2, %s124_s2 }
  0x5d   :  { %p931_p13 = scmp.ne.s32.totalorder %s124_s2, %s930_s29  ;;  %p936_p1 = scmp.lt.s32.totalorder %s930_s29, %s930_s29 }
  0x5f   :  { %p937_p2 = por %p936_p1, %p935_p0 }
  0x61   :  { %p938_p3 = pnand %p937_p2, %p931_p13 }
  0x63   :  { %941 = shalt.err (!%p938_p3)
}
  0x64   :  { %129 = dma.hbm_to_vmem [thread:$0]  %s1661_s8, 384, %s124_s2, [#allocation18], %s1227_s4, %s1227_s4, %s1228_s25  }
  0x65   :  { %s942_s26 = scalar_lea.hbm %s1665_s12, 128 }
  0x66   :  { %p943_p4 = scmp.ne.s32.totalorder %s1665_s12, %s942_s26  ;;  %p946_p5 = scmp.lt.u32.totalorder %s942_s26, %s1665_s12 }
  0x68   :  { %p948_p6 = pnand %p946_p5, %p943_p4 }
  0x6a   :  { %951 = shalt.err (!%p948_p6)
}
  0x6b   :  { %s952_s24 = scalar_lea.vmem %s151_s3, 128  ;;  %p957_p8 = scmp.lt.s32.totalorder %s151_s3, %s151_s3 }
  0x6c   :  { %p953_p7 = scmp.ne.s32.totalorder %s151_s3, %s952_s24  ;;  %p958_p9 = scmp.lt.s32.totalorder %s952_s24, %s952_s24 }
  0x6e   :  { %p959_p10 = por %p958_p9, %p957_p8 }
  0x70   :  { %p960_p11 = pnand %p959_p10, %p953_p7 }
  0x72   :  { %963 = shalt.err (!%p960_p11)
}
  0x73   :  { %153 = dma.hbm_to_vmem [thread:$0]  %s1665_s12, 128, %s151_s3, [#allocation21]  }
  0x74   :  { %s1231_s6 = smov [#allocation23]   ;;  %s1232_s29 = smov [#allocation26]  }
  0x75   :  { %s171_s28 = sshll.u32 %s1231_s6, 4  ;;  %s195_s30 = sshll.u32 %s1232_s29, 4  ;;  %s172_s28 = int_to_ptr.vmem [resolvable:$true] %s171_s28  ;;  %s196_s30 = int_to_ptr.vmem [resolvable:$true] %s195_s30 }
  0x76   :  { %s964_s21 = scalar_lea.hbm %s1668_s15, 1408 }
  0x77   :  { %p965_p12 = scmp.ne.s32.totalorder %s1668_s15, %s964_s21  ;;  %p968_p13 = scmp.lt.u32.totalorder %s964_s21, %s1668_s15 }
  0x79   :  { %p970_p0 = pnand %p968_p13, %p965_p12 }
  0x7b   :  { %973 = shalt.err (!%p970_p0)
}
  0x7c   :  { %s974_s12 = scalar_lea.vmem %s172_s28, 1408  ;;  %p979_p2 = scmp.lt.s32.totalorder %s172_s28, %s172_s28 }
  0x7d   :  { %p975_p1 = scmp.ne.s32.totalorder %s172_s28, %s974_s12  ;;  %p980_p3 = scmp.lt.s32.totalorder %s974_s12, %s974_s12 }
  0x7f   :  { %p981_p4 = por %p980_p3, %p979_p2 }
  0x81   :  { %p982_p5 = pnand %p981_p4, %p975_p1 }
  0x83   :  { %985 = shalt.err (!%p982_p5)
}
  0x84   :  { %177 = dma.hbm_to_vmem [thread:$0]  %s1668_s15, 1408, %s172_s28, [#allocation24], %s1227_s4, %s1227_s4, %s1228_s25  }
  0x85   :  { %s986_s2 = scalar_lea.hbm %s1670_s17, 3328 }
  0x86   :  { %p987_p6 = scmp.ne.s32.totalorder %s1670_s17, %s986_s2  ;;  %p990_p7 = scmp.lt.u32.totalorder %s986_s2, %s1670_s17 }
  0x88   :  { %p992_p8 = pnand %p990_p7, %p987_p6 }
  0x8a   :  { %995 = shalt.err (!%p992_p8)
}
  0x8b   :  { %s996_s21 = scalar_lea.vmem %s196_s30, 3328  ;;  %p1001_p10 = scmp.lt.s32.totalorder %s196_s30, %s196_s30 }
  0x8c   :  { %p997_p9 = scmp.ne.s32.totalorder %s196_s30, %s996_s21  ;;  %p1002_p11 = scmp.lt.s32.totalorder %s996_s21, %s996_s21 }
  0x8e   :  { %p1003_p12 = por %p1002_p11, %p1001_p10 }
  0x90   :  { %p1004_p13 = pnand %p1003_p12, %p997_p9 }
  0x92   :  { %1007 = shalt.err (!%p1004_p13)
}
  0x93   :  { %s1233_s15 = smov 256   ;;  %s1234_s28 = smov 16  }
  0x94   :  { %201 = dma.hbm_to_vmem [thread:$0]  %s1670_s17, 3328, %s196_s30, [#allocation27], %s1233_s15, %s1233_s15, %s1234_s28  }
  0x95   :  { %s1235_s0 = smov [#allocation5]   ;;  %s1236_s12 = smov [#allocation10]  }
  0x96   :  { %s42_s1 = sshll.u32 %s1235_s0, 4  ;;  %s61_s3 = sshll.u32 %s1236_s12, 4  ;;  %s43_s1 = int_to_ptr.vmem [resolvable:$true] %s42_s1  ;;  %s62_s3 = int_to_ptr.vmem [resolvable:$true] %s61_s3 }
  0x97   :  { %s1696_s8 = sld [smem:[#allocation39_spill]] }
  0x9d   :  { %s1008_s2 = scalar_lea.hbm %s1696_s8, 128 }
  0x9e   :  { %p1009_p0 = scmp.ne.s32.totalorder %s1696_s8, %s1008_s2  ;;  %p1012_p1 = scmp.lt.u32.totalorder %s1008_s2, %s1696_s8 }
  0xa0   :  { %p1014_p2 = pnand %p1012_p1, %p1009_p0 }
  0xa2   :  { %1017 = shalt.err (!%p1014_p2)
}
  0xa3   :  { %s1018_s17 = scalar_lea.vmem %s43_s1, 128  ;;  %p1023_p4 = scmp.lt.s32.totalorder %s43_s1, %s43_s1 }
  0xa4   :  { %p1019_p3 = scmp.ne.s32.totalorder %s43_s1, %s1018_s17  ;;  %p1024_p5 = scmp.lt.s32.totalorder %s1018_s17, %s1018_s17 }
  0xa6   :  { %p1025_p6 = por %p1024_p5, %p1023_p4 }
  0xa8   :  { %p1026_p7 = pnand %p1025_p6, %p1019_p3 }
  0xaa   :  { %1029 = shalt.err (!%p1026_p7)
}
  0xab   :  { %45 = dma.hbm_to_vmem [thread:$0]  %s1696_s8, 128, %s43_s1, [#allocation6]  }
  0xac   :  { %s1697_s0 = sld [smem:[#allocation41_spill]] }
  0xb2   :  { %s1030_s12 = scalar_lea.hbm %s1697_s0, 384 }
  0xb3   :  { %p1031_p8 = scmp.ne.s32.totalorder %s1697_s0, %s1030_s12  ;;  %p1034_p9 = scmp.lt.u32.totalorder %s1030_s12, %s1697_s0 }
  0xb5   :  { %p1036_p10 = pnand %p1034_p9, %p1031_p8 }
  0xb7   :  { %1039 = shalt.err (!%p1036_p10)
}
  0xb8   :  { %s1040_s29 = scalar_lea.vmem %s62_s3, 384  ;;  %p1045_p12 = scmp.lt.s32.totalorder %s62_s3, %s62_s3 }
  0xb9   :  { %p1041_p11 = scmp.ne.s32.totalorder %s62_s3, %s1040_s29  ;;  %p1046_p13 = scmp.lt.s32.totalorder %s1040_s29, %s1040_s29 }
  0xbb   :  { %p1047_p0 = por %p1046_p13, %p1045_p12 }
  0xbd   :  { %p1048_p1 = pnand %p1047_p0, %p1041_p11 }
  0xbf   :  { %1051 = shalt.err (!%p1048_p1)
}
  0xc0   :  { %67 = dma.hbm_to_vmem [thread:$0]  %s1697_s0, 384, %s62_s3, [#allocation9], %s1227_s4, %s1227_s4, %s1228_s25  }
  0xc1   :  { %s1237_s27 = smov [#allocation13]   ;;  %s1238_s17 = smov [#allocation16]  }
  0xc2   :  { %s85_s23 = sshll.u32 %s1237_s27, 4  ;;  %s109_s30 = sshll.u32 %s1238_s17, 4  ;;  %s86_s23 = int_to_ptr.vmem [resolvable:$true] %s85_s23  ;;  %s110_s30 = int_to_ptr.vmem [resolvable:$true] %s109_s30 }
  0xc3   :  { %s1698_s22 = sld [smem:[#allocation43_spill]] }
  0xc9   :  { %s1052_s12 = scalar_lea.hbm %s1698_s22, 384 }
  0xca   :  { %p1053_p2 = scmp.ne.s32.totalorder %s1698_s22, %s1052_s12  ;;  %p1056_p3 = scmp.lt.u32.totalorder %s1052_s12, %s1698_s22 }
  0xcc   :  { %p1058_p4 = pnand %p1056_p3, %p1053_p2 }
  0xce   :  { %1061 = shalt.err (!%p1058_p4)
}
  0xcf   :  { %s1062_s3 = scalar_lea.vmem %s86_s23, 384  ;;  %p1067_p6 = scmp.lt.s32.totalorder %s86_s23, %s86_s23 }
  0xd0   :  { %p1063_p5 = scmp.ne.s32.totalorder %s86_s23, %s1062_s3  ;;  %p1068_p7 = scmp.lt.s32.totalorder %s1062_s3, %s1062_s3 }
  0xd2   :  { %p1069_p8 = por %p1068_p7, %p1067_p6 }
  0xd4   :  { %p1070_p9 = pnand %p1069_p8, %p1063_p5 }
  0xd6   :  { %1073 = shalt.err (!%p1070_p9)
}
  0xd7   :  { %91 = dma.hbm_to_vmem [thread:$0]  %s1698_s22, 384, %s86_s23, [#allocation12], %s1227_s4, %s1227_s4, %s1228_s25  }
  0xd8   :  { %s1699_s27 = sld [smem:[#allocation45_spill]] }
  0xde   :  { %s1074_s17 = scalar_lea.hbm %s1699_s27, 384 }
  0xdf   :  { %p1075_p10 = scmp.ne.s32.totalorder %s1699_s27, %s1074_s17  ;;  %p1078_p11 = scmp.lt.u32.totalorder %s1074_s17, %s1699_s27 }
  0xe1   :  { %p1080_p12 = pnand %p1078_p11, %p1075_p10 }
  0xe3   :  { %1083 = shalt.err (!%p1080_p12)
}
  0xe4   :  { %s1084_s24 = scalar_lea.vmem %s110_s30, 384  ;;  %p1089_p0 = scmp.lt.s32.totalorder %s110_s30, %s110_s30 }
  0xe5   :  { %p1085_p13 = scmp.ne.s32.totalorder %s110_s30, %s1084_s24  ;;  %p1090_p1 = scmp.lt.s32.totalorder %s1084_s24, %s1084_s24 }
  0xe7   :  { %p1091_p2 = por %p1090_p1, %p1089_p0 }
  0xe9   :  { %p1092_p3 = pnand %p1091_p2, %p1085_p13 }
  0xeb   :  { %1095 = shalt.err (!%p1092_p3)
}
  0xec   :  { %115 = dma.hbm_to_vmem [thread:$0]  %s1699_s27, 384, %s110_s30, [#allocation15], %s1227_s4, %s1227_s4, %s1228_s25  }
  0xed   :  { %s1239_s2 = smov [#allocation19]   ;;  %s1240_s3 = smov [#allocation22]  }
  0xee   :  { %s138_s6 = sshll.u32 %s1239_s2, 4  ;;  %s162_s0 = sshll.u32 %s1240_s3, 4  ;;  %s139_s6 = int_to_ptr.vmem [resolvable:$true] %s138_s6  ;;  %s163_s0 = int_to_ptr.vmem [resolvable:$true] %s162_s0 }
  0xef   :  { %s1096_s8 = scalar_lea.hbm %s1663_s10, 128 }
  0xf0   :  { %p1097_p4 = scmp.ne.s32.totalorder %s1663_s10, %s1096_s8  ;;  %p1100_p5 = scmp.lt.u32.totalorder %s1096_s8, %s1663_s10 }
  0xf2   :  { %p1102_p6 = pnand %p1100_p5, %p1097_p4 }
  0xf4   :  { %1105 = shalt.err (!%p1102_p6)
}
  0xf5   :  { %s1106_s30 = scalar_lea.vmem %s139_s6, 128  ;;  %p1111_p8 = scmp.lt.s32.totalorder %s139_s6, %s139_s6 }
  0xf6   :  { %p1107_p7 = scmp.ne.s32.totalorder %s139_s6, %s1106_s30  ;;  %p1112_p9 = scmp.lt.s32.totalorder %s1106_s30, %s1106_s30 }
  0xf8   :  { %p1113_p10 = por %p1112_p9, %p1111_p8 }
  0xfa   :  { %p1114_p11 = pnand %p1113_p10, %p1107_p7 }
  0xfc   :  { %1117 = shalt.err (!%p1114_p11)
}
  0xfd   :  { %141 = dma.hbm_to_vmem [thread:$0]  %s1663_s10, 128, %s139_s6, [#allocation18]  }
  0xfe   :  { %s1118_s22 = scalar_lea.hbm %s1667_s14, 128 }
  0xff   :  { %p1119_p12 = scmp.ne.s32.totalorder %s1667_s14, %s1118_s22  ;;  %p1122_p13 = scmp.lt.u32.totalorder %s1118_s22, %s1667_s14 }
 0x101   :  { %p1124_p0 = pnand %p1122_p13, %p1119_p12 }
 0x103   :  { %1127 = shalt.err (!%p1124_p0)
}
 0x104   :  { %s1128_s8 = scalar_lea.vmem %s163_s0, 128  ;;  %p1133_p2 = scmp.lt.s32.totalorder %s163_s0, %s163_s0 }
 0x105   :  { %p1129_p1 = scmp.ne.s32.totalorder %s163_s0, %s1128_s8  ;;  %p1134_p3 = scmp.lt.s32.totalorder %s1128_s8, %s1128_s8 }
 0x107   :  { %p1135_p4 = por %p1134_p3, %p1133_p2 }
 0x109   :  { %p1136_p5 = pnand %p1135_p4, %p1129_p1 }
 0x10b   :  { %1139 = shalt.err (!%p1136_p5)
}
 0x10c   :  { %165 = dma.hbm_to_vmem [thread:$0]  %s1667_s14, 128, %s163_s0, [#allocation21]  }
 0x10d   :  { %s1241_s17 = smov [#allocation25]   ;;  %s1242_s26 = smov [#allocation28]  }
 0x10e   :  { %s183_s21 = sshll.u32 %s1241_s17, 4  ;;  %s207_s12 = sshll.u32 %s1242_s26, 4  ;;  %s184_s21 = int_to_ptr.vmem [resolvable:$true] %s183_s21  ;;  %s208_s12 = int_to_ptr.vmem [resolvable:$true] %s207_s12 }
 0x10f   :  { %s1140_s5 = scalar_lea.hbm %s1669_s16, 1408 }
 0x110   :  { %p1141_p6 = scmp.ne.s32.totalorder %s1669_s16, %s1140_s5  ;;  %p1144_p7 = scmp.lt.u32.totalorder %s1140_s5, %s1669_s16 }
 0x112   :  { %p1146_p8 = pnand %p1144_p7, %p1141_p6 }
 0x114   :  { %1149 = shalt.err (!%p1146_p8)
}
 0x115   :  { %s1150_s14 = scalar_lea.vmem %s184_s21, 1408  ;;  %p1155_p10 = scmp.lt.s32.totalorder %s184_s21, %s184_s21 }
 0x116   :  { %p1151_p9 = scmp.ne.s32.totalorder %s184_s21, %s1150_s14  ;;  %p1156_p11 = scmp.lt.s32.totalorder %s1150_s14, %s1150_s14 }
 0x118   :  { %p1157_p12 = por %p1156_p11, %p1155_p10 }
 0x11a   :  { %p1158_p13 = pnand %p1157_p12, %p1151_p9 }
 0x11c   :  { %1161 = shalt.err (!%p1158_p13)
}
 0x11d   :  { %189 = dma.hbm_to_vmem [thread:$0]  %s1669_s16, 1408, %s184_s21, [#allocation24], %s1227_s4, %s1227_s4, %s1228_s25  }
 0x11e   :  { %s1162_s8 = scalar_lea.hbm %s1671_s18, 3328 }
 0x11f   :  { %p1163_p0 = scmp.ne.s32.totalorder %s1671_s18, %s1162_s8  ;;  %p1166_p1 = scmp.lt.u32.totalorder %s1162_s8, %s1671_s18 }
 0x121   :  { %p1168_p2 = pnand %p1166_p1, %p1163_p0 }
 0x123   :  { %1171 = shalt.err (!%p1168_p2)
}
 0x124   :  { %s1172_s30 = scalar_lea.vmem %s208_s12, 3328  ;;  %p1177_p4 = scmp.lt.s32.totalorder %s208_s12, %s208_s12 }
 0x125   :  { %p1173_p3 = scmp.ne.s32.totalorder %s208_s12, %s1172_s30  ;;  %p1178_p5 = scmp.lt.s32.totalorder %s1172_s30, %s1172_s30 }
 0x127   :  { %p1179_p6 = por %p1178_p5, %p1177_p4 }
 0x129   :  { %p1180_p7 = pnand %p1179_p6, %p1173_p3 }
 0x12b   :  { %1183 = shalt.err (!%p1180_p7)
}
 0x12c   :  { %213 = dma.hbm_to_vmem [thread:$0]  %s1671_s18, 3328, %s208_s12, [#allocation27], %s1233_s15, %s1233_s15, %s1234_s28  }
 0x12d   :  { %1206 = dma.done.wait [#allocation6], 128  }
 0x12e   :  { %1207 = vsyncadd [#allocation6], 4294967168 }
 0x12f   :  { %1208 = dma.done.wait [#allocation9], 512  }
 0x130   :  { %1209 = vsyncadd [#allocation9], 4294966784 }
 0x131   :  { %1210 = dma.done.wait [#allocation12], 768  }
 0x132   :  { %1211 = vsyncadd [#allocation12], 4294966528 }
 0x133   :  { %1212 = dma.done.wait [#allocation15], 768  }
 0x134   :  { %1213 = vsyncadd [#allocation15], 4294966528 }
 0x135   :  { %1214 = dma.done.wait [#allocation18], 512  }
 0x136   :  { %1215 = vsyncadd [#allocation18], 4294966784 }
 0x137   :  { %1216 = dma.done.wait [#allocation21], 256  }
 0x138   :  { %1217 = vsyncadd [#allocation21], 4294967040 }
 0x139   :  { %1218 = dma.done.wait [#allocation24], 2816  }
 0x13a   :  { %1219 = vsyncadd [#allocation24], 4294964480 }
 0x13b   :  { %1220 = dma.done.wait [#allocation27], 6656  }
 0x13c   :  { %1221 = vsyncadd [#allocation27], 4294960640  ;;  %v277_v0 = vld [vmem:[#allocation5] sm:$0xff]  ;;  %v278_v1 = vld [vmem:[#allocation8] sm:$0xff]  ;;  %s1700_s14 = sld [smem:[#allocation46_spill]] }
 0x13d   :  { %v304_v2 = vld [vmem:[#allocation13] sm:$0xff]  ;;  %v279_v3 = vsub.f32 %v277_v0, %v278_v1  ;;  %v305_v4 = vld [vmem:[#allocation13 + $0x8] sm:$0xff]  ;;  %v306_v5 = vld [vmem:[#allocation13 + $0x10] sm:$0xff] }
 0x13e   :  { %v307_v6 = vld [vmem:[#allocation14] sm:$0xff]  ;;  %v308_v7 = vld [vmem:[#allocation14 + $0x8] sm:$0xff]  ;;  %v309_v8 = vld [vmem:[#allocation14 + $0x10] sm:$0xff] }
 0x13f   :  { %v310_v9 = vld [vmem:[#allocation16] sm:$0xff]  ;;  %v313_v10 = vsub.f32 1.0, %v307_v6  ;;  %v331_v11 = vmul.f32 %v307_v6, %v304_v2  ;;  %v280_v12 = vand.u32 2147483647, %v279_v3  ;;  %v311_v13 = vld [vmem:[#allocation16 + $0x8] sm:$0xff]  ;;  %v312_v14 = vld [vmem:[#allocation16 + $0x10] sm:$0xff]  ;;  %v332_v17 = vmul.f32 %v308_v7, %v305_v4 }
 0x140   :  { %v314_v15 = vsub.f32 1.0, %v308_v7  ;;  %v315_v16 = vsub.f32 1.0, %v309_v8  ;;  %v325_v19 = vsub.f32 1.0, %v310_v9  ;;  %v333_v22 = vmul.f32 %v309_v8, %v306_v5  ;;  %v286_v28 = vld [vmem:[#allocation10] sm:$0xff]  ;;  %v287_v29 = vld [vmem:[#allocation10 + $0x8] sm:$0xff]  ;;  %v288_v30 = vld [vmem:[#allocation10 + $0x10] sm:$0xff] }
 0x141   :  { %v316_v18 = vmul.f32 %v313_v10, %v304_v2  ;;  %377 = vadd.xlane.f32.xlu0 %v280_v12  ;;  %v334_v23 = vadd.f32 %v331_v11, %v313_v10  ;;  %v326_v25 = vsub.f32 1.0, %v311_v13  ;;  %v327_v26 = vsub.f32 1.0, %v312_v14  ;;  %v289_v35 = vld [vmem:[#allocation11] sm:$0xff]  ;;  %v290_v36 = vld [vmem:[#allocation11 + $0x8] sm:$0xff]  ;;  %v291_v37 = vld [vmem:[#allocation11 + $0x10] sm:$0xff] }
 0x142   :  { %v317_v20 = vmul.f32 %v314_v15, %v305_v4  ;;  %v318_v21 = vmul.f32 %v315_v16, %v306_v5  ;;  %v335_v27 = vadd.f32 %v332_v17, %v314_v15  ;;  %v336_v33 = vadd.f32 %v333_v22, %v315_v16  ;;  %v355_v40 = vld [vmem:[#allocation17] sm:$0xff]  ;;  %v356_v48 = vld [vmem:[#allocation17 + $0x8] sm:$0xff]  ;;  %v348_v52 = vld [vmem:[%s1660_s7 + $0x10] sm:$0xff] }
 0x143   :  { %v319_v24 = vadd.f32 %v316_v18, %v307_v6  ;;  %v337_v34 = vmul.f32 %v334_v23, %v310_v9  ;;  %v292_v41 = vsub.f32 %v286_v28, %v289_v35  ;;  %v293_v42 = vsub.f32 %v287_v29, %v290_v36  ;;  %v346_v47 = vld [vmem:[%s1660_s7] sm:$0xff]  ;;  %v347_v51 = vld [vmem:[%s1660_s7 + $0x8] sm:$0xff]  ;;  %v357_v53 = vld [vmem:[#allocation17 + $0x10] sm:$0xff] }
 0x144   :  { %v320_v31 = vadd.f32 %v317_v20, %v308_v7  ;;  %v321_v32 = vadd.f32 %v318_v21, %v309_v8  ;;  %v338_v39 = vmul.f32 %v335_v27, %v311_v13  ;;  %v339_v45 = vmul.f32 %v336_v33, %v312_v14  ;;  %v429_v0 = vld [vmem:[#allocation19] sm:$0xff]  ;;  %v430_v5 = vld [vmem:[%s1664_s11] sm:$0xff]  ;;  %v470_v7 = vld [vmem:[#allocation23] sm:$0xff] }
 0x145   :  { %v322_v38 = vmul.f32 %v319_v24, %v310_v9  ;;  %v340_v46 = vadd.f32 %v337_v34, %v325_v19  ;;  %v294_v54 = vsub.f32 %v288_v30, %v291_v37  ;;  %v295_v55 = vand.u32 2147483647, %v292_v41  ;;  %v431_v6 = vld [vmem:[#allocation20] sm:$0xff]  ;;  %v471_v11 = vld [vmem:[#allocation23 + $0x8] sm:$0xff]  ;;  %v481_v12 = vld [vmem:[#allocation25] sm:$0xff] }
 0x146   :  { %v323_v43 = vmul.f32 %v320_v31, %v311_v13  ;;  %v324_v44 = vmul.f32 %v321_v32, %v312_v14  ;;  %v341_v50 = vadd.f32 %v338_v39, %v326_v25  ;;  %v342_v58 = vadd.f32 %v339_v45, %v327_v26  ;;  %v472_v21 = vld [vmem:[#allocation23 + $0x10] sm:$0xff]  ;;  %v482_v22 = vld [vmem:[#allocation25 + $0x8] sm:$0xff]  ;;  %v483_v23 = vld [vmem:[#allocation25 + $0x10] sm:$0xff] }
 0x147   :  { %v328_v49 = vadd.f32 %v325_v19, %v322_v38  ;;  %v358_v59 = vsub.f32 %v340_v46, %v355_v40  ;;  %v296_v62 = vand.u32 2147483647, %v293_v42  ;;  %v297_v63 = vand.u32 2147483647, %v294_v54  ;;  %v473_v28 = vld [vmem:[#allocation23 + $0x18] sm:$0xff]  ;;  %v484_v29 = vld [vmem:[#allocation25 + $0x18] sm:$0xff] }
 0x148   :  { %v329_v56 = vadd.f32 %v326_v25, %v323_v43  ;;  %v330_v57 = vadd.f32 %v327_v26, %v324_v44  ;;  %v359_v61 = vsub.f32 %v341_v50, %v356_v48  ;;  %v360_v3 = vsub.f32 %v342_v58, %v357_v53  ;;  %v417_v31 = vld [vmem:[%s1662_s9] sm:$0xff]  ;;  %v457_v36 = vld [vmem:[#allocation22] sm:$0xff]  ;;  %v474_v37 = vld [vmem:[#allocation23 + $0x20] sm:$0xff] }
 0x149   :  { %v349_v60 = vsub.f32 %v328_v49, %v346_v47  ;;  %v361_v4 = vand.u32 2147483647, %v358_v59  ;;  %v390_v10 = vadd.f32 %v296_v62, %v295_v55  ;;  %v432_v16 = vmul.f32 %v429_v0, %v429_v0  ;;  %v456_v32 = vld [vmem:[%s1666_s13] sm:$0xff]  ;;  %v485_v38 = vld [vmem:[#allocation25 + $0x20] sm:$0xff]  ;;  %v475_v43 = vld [vmem:[#allocation23 + $0x28] sm:$0xff] }
 0x14a   :  { %v350_v1 = vsub.f32 %v329_v56, %v347_v51  ;;  %v351_v2 = vsub.f32 %v330_v57, %v348_v52  ;;  %v362_v9 = vand.u32 2147483647, %v359_v61  ;;  %v363_v15 = vand.u32 2147483647, %v360_v3  ;;  %v486_v44 = vld [vmem:[#allocation25 + $0x28] sm:$0xff]  ;;  %v476_v49 = vld [vmem:[#allocation23 + $0x30] sm:$0xff] }
 0x14b   :  { %v352_v8 = vand.u32 2147483647, %v349_v60  ;;  %v391_v18 = vadd.f32 %v390_v10, %v297_v63  ;;  %v433_v19 = vmul.f32 %v430_v5, %v430_v5  ;;  %v435_v20 = vmul.f32 %v431_v6, %v431_v6  ;;  %v487_v50 = vld [vmem:[#allocation25 + $0x30] sm:$0xff]  ;;  %v477_v54 = vld [vmem:[#allocation23 + $0x38] sm:$0xff]  ;;  %v488_v55 = vld [vmem:[#allocation25 + $0x38] sm:$0xff] }
 0x14c   :  { %v353_v13 = vand.u32 2147483647, %v350_v1  ;;  %v354_v14 = vand.u32 2147483647, %v351_v2  ;;  %v492_v26 = vsub.f32 %v470_v7, %v481_v12  ;;  %v493_v33 = vsub.f32 %v471_v11, %v482_v22  ;;  %v478_v60 = vld [vmem:[#allocation23 + $0x40] sm:$0xff]  ;;  %v489_v61 = vld [vmem:[#allocation25 + $0x40] sm:$0xff] }
 0x14d   :  { %v364_v17 = vadd.f32 %v361_v4, %v352_v8  ;;  %392 = vadd.xlane.f32.xlu0 %v391_v18  ;;  %v434_v27 = vadd.f32 %v433_v19, %v432_v16  ;;  %v494_v34 = vsub.f32 %v472_v21, %v483_v23  ;;  %v495_v40 = vsub.f32 %v473_v28, %v484_v29  ;;  %v479_v62 = vld [vmem:[#allocation23 + $0x48] sm:$0xff]  ;;  %v490_v63 = vld [vmem:[#allocation25 + $0x48] sm:$0xff]  ;;  %v480_v8 = vld [vmem:[#allocation23 + $0x50] sm:$0xff] }
 0x14e   :  { %v365_v24 = vadd.f32 %v362_v9, %v353_v13  ;;  %v366_v25 = vadd.f32 %v363_v15, %v354_v14  ;;  %v503_v41 = vmul.f32 %v492_v26, %v492_v26  ;;  %v418_v42 = vmul.f32 %v417_v31, %v417_v31  ;;  %v491_v9 = vld [vmem:[#allocation25 + $0x50] sm:$0xff]  ;;  %v560_v26 = vld [vmem:[#allocation28] sm:$0xff] }
 0x14f   :  { %v436_v35 = vadd.f32 %v435_v20, %v434_v27  ;;  %v458_v45 = vsub.f32 %v456_v32, %v457_v36  ;;  %v496_v46 = vsub.f32 %v474_v37, %v485_v38  ;;  %v504_v47 = vmul.f32 %v493_v33, %v493_v33  ;;  %v561_v27 = vld [vmem:[#allocation28 + $0x8] sm:$0xff]  ;;  %v536_v31 = vld [vmem:[#allocation26 + $0x10] sm:$0xff]  ;;  %v562_v32 = vld [vmem:[#allocation28 + $0x10] sm:$0xff] }
 0x150   :  { %v405_v30 = vadd.f32 %v365_v24, %v364_v17  ;;  %v505_v48 = vmul.f32 %v494_v34, %v494_v34  ;;  %v497_v51 = vsub.f32 %v475_v43, %v486_v44  ;;  %v506_v52 = vmul.f32 %v495_v40, %v495_v40  ;;  %v534_v24 = vld [vmem:[#allocation26] sm:$0xff]  ;;  %v537_v36 = vld [vmem:[#allocation26 + $0x18] sm:$0xff]  ;;  %v563_v37 = vld [vmem:[#allocation28 + $0x18] sm:$0xff] }
 0x151   :  { %852 = vrsqrt.f32 %v436_v35  ;;  %v514_v53 = vadd.f32 %v504_v47, %v503_v41  ;;  %v459_v56 = vmul.f32 %v458_v45, %v458_v45  ;;  %v498_v57 = vsub.f32 %v476_v49, %v487_v50  ;;  %v638_v41 = vld [vmem:[%s1672_s19] sm:$0x3] }
 0x152   :  { %v406_v39 = vadd.f32 %v405_v30, %v366_v25  ;;  %v507_v58 = vmul.f32 %v496_v46, %v496_v46  ;;  %v499_v0 = vsub.f32 %v477_v54, %v488_v55  ;;  %v508_v1 = vmul.f32 %v497_v51, %v497_v51  ;;  %v535_v25 = vld [vmem:[#allocation26 + $0x8] sm:$0xff]  ;;  %v538_v45 = vld [vmem:[#allocation26 + $0x20] sm:$0xff]  ;;  %v564_v46 = vld [vmem:[#allocation28 + $0x20] sm:$0xff] }
 0x153   :  { %v515_v59 = vadd.f32 %v514_v53, %v505_v48  ;;  %v500_v3 = vsub.f32 %v478_v60, %v489_v61  ;;  %v509_v4 = vmul.f32 %v498_v57, %v498_v57  ;;  %vm439_vm0 = vcmp.eq.f32.partialorder %v436_v35, inf  ;;  %v565_v53 = vld [vmem:[#allocation28 + $0x28] sm:$0xff]  ;;  %v566_v57 = vld [vmem:[#allocation28 + $0x30] sm:$0xff] }
 0x154   :  { %407 = vadd.xlane.f32.xlu1 %v406_v39  ;;  %v442_v7 = vand.u32 2147483648, %v436_v35  ;;  %v501_v10 = vsub.f32 %v479_v62, %v490_v63  ;;  %v640_v11 = vlaneseq  ;;  %vm441_vm1 = vcmp.eq.f32.partialorder %v436_v35, 0.0  ;;  %v541_v62 = vld [vmem:[#allocation26 + $0x38] sm:$0xff]  ;;  %v567_v63 = vld [vmem:[#allocation28 + $0x38] sm:$0xff] }
 0x155   :  { %v516_v2 = vadd.f32 %v515_v59, %v506_v52  ;;  %v510_v13 = vmul.f32 %v499_v0, %v499_v0  ;;  %v502_v16 = vsub.f32 %v480_v8, %v491_v9  ;;  %v511_v17 = vmul.f32 %v500_v3, %v500_v3  ;;  %v539_v52 = vld [vmem:[#allocation26 + $0x28] sm:$0xff]  ;;  %v542_v3 = vld [vmem:[#allocation26 + $0x40] sm:$0xff] }
 0x156   :  { %v641_v20 = vshrl.u32 %v640_v11, 7  ;;  %v512_v22 = vmul.f32 %v501_v10, %v501_v10  ;;  %v586_v38 = vsub.f32 %v534_v24, %v560_v26  ;;  %v587_v39 = vsub.f32 %v535_v25, %v561_v27  ;;  %v543_v9 = vld [vmem:[#allocation26 + $0x48] sm:$0xff]  ;;  %v569_v10 = vld [vmem:[#allocation28 + $0x48] sm:$0xff] }
 0x157   :  { %v517_v5 = vadd.f32 %v516_v2, %v507_v58  ;;  %v513_v29 = vmul.f32 %v502_v16, %v502_v16  ;;  %v588_v43 = vsub.f32 %v536_v31, %v562_v32  ;;  %v589_v47 = vsub.f32 %v537_v36, %v563_v37  ;;  %v544_v16 = vld [vmem:[#allocation26 + $0x50] sm:$0xff] }
 0x158   :  { %419 = vadd.xlane.f32.xlu1 %v418_v42  ;;  %v642_v33 = vsub.s32 0, %v641_v20  ;;  %v646_v40 = vsub.s32 1, %v641_v20  ;;  %v612_v48 = vmul.f32 %v586_v38, %v586_v38  ;;  %v613_v49 = vmul.f32 %v587_v39, %v587_v39 }
 0x159   :  { %v518_v14 = vadd.f32 %v517_v5, %v508_v1  ;;  %v590_v54 = vsub.f32 %v538_v45, %v564_v46  ;;  %v614_v55 = vmul.f32 %v588_v43, %v588_v43  ;;  %v591_v58 = vsub.f32 %v539_v52, %v565_v53  ;;  %v549_v46 = vld [vmem:[#allocation26 + $0x78] sm:$0xff] }
 0x15a   :  { %v1594_v50 = vrot.slane %v638_v41, %v642_v33  ;;  %v1596_v51 = vrot.slane %v638_v41, %v646_v40  ;;  %v615_v59 = vmul.f32 %v589_v47, %v589_v47  ;;  %v593_v5 = vsub.f32 %v541_v62, %v567_v63  ;;  %v548_v40 = vld [vmem:[#allocation26 + $0x70] sm:$0xff]  ;;  %v574_v41 = vld [vmem:[#allocation28 + $0x70] sm:$0xff]  ;;  %v575_v47 = vld [vmem:[#allocation28 + $0x78] sm:$0xff] }
 0x15b   :  { %v853_v6 = vpop.eup %852  ;;  %v519_v18 = vadd.f32 %v518_v14, %v509_v4  ;;  %v616_v1 = vmul.f32 %v590_v54, %v590_v54  ;;  %v568_v4 = vld [vmem:[#allocation28 + $0x40] sm:$0xff]  ;;  %v550_v54 = vld [vmem:[#allocation26 + $0x80] sm:$0xff] }
 0x15c   :  { %460 = vadd.xlane.f32.xlu1 %v459_v56  ;;  %v438_v12 = vmul.f32 %v853_v6, %v436_v35  ;;  %v540_v56 = vld [vmem:[#allocation26 + $0x30] sm:$0xff]  ;;  %v650_v60 = vmul.f32 %v1594_v50, %v612_v48  ;;  %v651_v61 = vmul.f32 %v1596_v51, %v613_v49  ;;  %v652_v2 = vmul.f32 %v1594_v50, %v614_v55 }
 0x15d   :  { %v520_v23 = vadd.f32 %v519_v18, %v510_v13  ;;  %v592_v0 = vsub.f32 %v540_v56, %v566_v57  ;;  %v617_v6 = vmul.f32 %v591_v58, %v591_v58  ;;  %v654_v14 = vmul.f32 %v1594_v50, %v616_v1  ;;  %v576_v55 = vld [vmem:[#allocation28 + $0x80] sm:$0xff] }
 0x15e   :  { %v440_v15 = vsel %vm439_vm0, %v436_v35, %v438_v12  ;;  %v711_v35 = vld [vmem:[%s1673_s20] sm:$0xff]  ;;  %v676_v8 = vadd.f32 %v651_v61, %v650_v60  ;;  %v594_v12 = vsub.f32 %v542_v3, %v568_v4  ;;  %v595_v18 = vsub.f32 %v543_v9, %v569_v10  ;;  %v551_v60 = vld [vmem:[#allocation26 + $0x88] sm:$0xff]  ;;  %v577_v61 = vld [vmem:[#allocation28 + $0x88] sm:$0xff] }
 0x15f   :  { %v443_v19 = vsel %vm441_vm1, %v442_v7, %v440_v15  ;;  %v521_v30 = vadd.f32 %v520_v23, %v511_v17  ;;  %v712_v44 = vmul.f32 %v711_v35, %v711_v35  ;;  %v653_v7 = vmul.f32 %v1596_v51, %v615_v59  ;;  %v570_v17 = vld [vmem:[#allocation28 + $0x50] sm:$0xff]  ;;  %v571_v23 = vld [vmem:[#allocation28 + $0x58] sm:$0xff]  ;;  %v573_v35 = vld [vmem:[#allocation28 + $0x68] sm:$0xff] }
 0x160   :  { %v811_v21 = vadd.f32 -1.0, %v443_v19  ;;  %v618_v13 = vmul.f32 %v592_v0, %v592_v0  ;;  %v677_v15 = vadd.f32 %v676_v8, %v652_v2  ;;  %v619_v19 = vmul.f32 %v593_v5, %v593_v5  ;;  %v552_v2 = vld [vmem:[#allocation26 + $0x90] sm:$0xff]  ;;  %v578_v3 = vld [vmem:[#allocation28 + $0x90] sm:$0xff]  ;;  %v553_v8 = vld [vmem:[#allocation26 + $0x98] sm:$0xff] }
 0x161   :  { %v522_v34 = vadd.f32 %v521_v30, %v512_v22  ;;  %v655_v20 = vmul.f32 %v1596_v51, %v617_v6  ;;  %v545_v22 = vld [vmem:[#allocation26 + $0x58] sm:$0xff]  ;;  %v596_v24 = vsub.f32 %v544_v16, %v570_v17  ;;  %v620_v25 = vmul.f32 %v594_v12, %v594_v12  ;;  %v579_v9 = vld [vmem:[#allocation28 + $0x98] sm:$0xff]  ;;  %v580_v16 = vld [vmem:[#allocation28 + $0xa0] sm:$0xff] }
 0x162   :  { %v445_v28 = vmul.f32 %v811_v21, %v811_v21  ;;  %v678_v21 = vadd.f32 %v677_v15, %v653_v7  ;;  %v656_v26 = vmul.f32 %v1594_v50, %v618_v13  ;;  %v597_v30 = vsub.f32 %v545_v22, %v571_v23  ;;  %v554_v15 = vld [vmem:[#allocation26 + $0xa0] sm:$0xff]  ;;  %v581_v22 = vld [vmem:[#allocation28 + $0xa8] sm:$0xff] }
 0x163   :  { %v523_v42 = vadd.f32 %v522_v34, %v513_v29  ;;  %v572_v29 = vld [vmem:[#allocation28 + $0x60] sm:$0xff]  ;;  %v621_v31 = vmul.f32 %v595_v18, %v595_v18  ;;  %v657_v32 = vmul.f32 %v1596_v51, %v619_v19  ;;  %v547_v34 = vld [vmem:[#allocation26 + $0x68] sm:$0xff]  ;;  %v622_v37 = vmul.f32 %v596_v24, %v596_v24 }
 0x164   :  { %446 = vadd.xlane.f32.xlu0 %v445_v28  ;;  %v679_v27 = vadd.f32 %v678_v21, %v654_v14  ;;  %v546_v28 = vld [vmem:[#allocation26 + $0x60] sm:$0xff]  ;;  %v658_v38 = vmul.f32 %v1594_v50, %v620_v25  ;;  %v623_v43 = vmul.f32 %v597_v30, %v597_v30  ;;  %v600_v48 = vsub.f32 %v548_v40, %v574_v41  ;;  %v555_v21 = vld [vmem:[#allocation26 + $0xa8] sm:$0xff]  ;;  %v584_v40 = vld [vmem:[#allocation28 + $0xc0] sm:$0xff] }
 0x165   :  { %v598_v36 = vsub.f32 %v546_v28, %v572_v29  ;;  %v660_v52 = vmul.f32 %v1594_v50, %v622_v37  ;;  %v601_v56 = vsub.f32 %v549_v46, %v575_v47  ;;  %v602_v62 = vsub.f32 %v550_v54, %v576_v55  ;;  %v582_v28 = vld [vmem:[#allocation28 + $0xb0] sm:$0xff]  ;;  %v585_v46 = vld [vmem:[#allocation28 + $0xc8] sm:$0xff] }
 0x166   :  { %v680_v33 = vadd.f32 %v679_v27, %v655_v20  ;;  %v661_v58 = vmul.f32 %v1596_v51, %v623_v43  ;;  %v626_v63 = vmul.f32 %v600_v48, %v600_v48  ;;  %v603_v4 = vsub.f32 %v551_v60, %v577_v61  ;;  %v556_v27 = vld [vmem:[#allocation26 + $0xb0] sm:$0xff] }
 0x167   :  { %v624_v49 = vmul.f32 %v598_v36, %v598_v36  ;;  %v627_v5 = vmul.f32 %v601_v56, %v601_v56  ;;  %v604_v10 = vsub.f32 %v552_v2, %v578_v3  ;;  %v628_v12 = vmul.f32 %v602_v62, %v602_v62 }
 0x168   :  { %524 = vadd.xlane.f32.xlu0 %v523_v42  ;;  %v681_v39 = vadd.f32 %v680_v33, %v656_v26  ;;  %v599_v42 = vsub.f32 %v547_v34, %v573_v35  ;;  %v664_v13 = vmul.f32 %v1594_v50, %v626_v63  ;;  %v605_v17 = vsub.f32 %v553_v8, %v579_v9  ;;  %v557_v33 = vld [vmem:[#allocation26 + $0xb8] sm:$0xff]  ;;  %v583_v34 = vld [vmem:[#allocation28 + $0xb8] sm:$0xff] }
 0x169   :  { %v662_v0 = vmul.f32 %v1594_v50, %v624_v49  ;;  %v629_v18 = vmul.f32 %v603_v4, %v603_v4  ;;  %v665_v19 = vmul.f32 %v1596_v51, %v627_v5  ;;  %v606_v23 = vsub.f32 %v554_v15, %v580_v16  ;;  %v723_v4 = vld [vmem:[%s1700_s14] sm:$0xff] }
 0x16a   :  { %v682_v45 = vadd.f32 %v681_v39, %v657_v32  ;;  %v625_v57 = vmul.f32 %v599_v42, %v599_v42  ;;  %v630_v24 = vmul.f32 %v604_v10, %v604_v10  ;;  %v666_v25 = vmul.f32 %v1594_v50, %v628_v12  ;;  %v558_v39 = vld [vmem:[#allocation26 + $0xc0] sm:$0xff] }
 0x16b   :  { %v607_v29 = vsub.f32 %v555_v21, %v581_v22  ;;  %v631_v30 = vmul.f32 %v605_v17, %v605_v17  ;;  %v608_v35 = vsub.f32 %v556_v27, %v582_v28  ;;  %v632_v36 = vmul.f32 %v606_v23, %v606_v23 }
 0x16c   :  { %713 = vadd.xlane.f32.xlu0 %v712_v44  ;;  %v659_v44 = vmul.f32 %v1596_v51, %v621_v31  ;;  %v683_v53 = vadd.f32 %v682_v45, %v658_v38  ;;  %v663_v6 = vmul.f32 %v1596_v51, %v625_v57  ;;  %v667_v31 = vmul.f32 %v1596_v51, %v629_v18  ;;  %v559_v45 = vld [vmem:[#allocation26 + $0xc8] sm:$0xff] }
 0x16d   :  { %v668_v37 = vmul.f32 %v1594_v50, %v630_v24  ;;  %v609_v41 = vsub.f32 %v557_v33, %v583_v34  ;;  %v633_v42 = vmul.f32 %v607_v29, %v607_v29  ;;  %v669_v43 = vmul.f32 %v1596_v51, %v631_v30 }
 0x16e   :  { %v684_v59 = vadd.f32 %v683_v53, %v659_v44  ;;  %v610_v47 = vsub.f32 %v558_v39, %v584_v40  ;;  %v634_v48 = vmul.f32 %v608_v35, %v608_v35  ;;  %v670_v49 = vmul.f32 %v1594_v50, %v632_v36 }
 0x16f   :  { %v611_v53 = vsub.f32 %v559_v45, %v585_v46  ;;  %v635_v54 = vmul.f32 %v609_v41, %v609_v41  ;;  %v671_v55 = vmul.f32 %v1596_v51, %v633_v42 }
 0x170   :  { %v685_v1 = vadd.f32 %v684_v59, %v660_v52  ;;  %v636_v57 = vmul.f32 %v610_v47, %v610_v47 }
 0x171   :  { %v637_v60 = vmul.f32 %v611_v53, %v611_v53  ;;  %v673_v61 = vmul.f32 %v1596_v51, %v635_v54 }
 0x172   :  { %v686_v7 = vadd.f32 %v685_v1, %v661_v58  ;;  %v672_v58 = vmul.f32 %v1594_v50, %v634_v48  ;;  %v674_v63 = vmul.f32 %v1594_v50, %v636_v57 }
 0x173   :  { %v675_v1 = vmul.f32 %v1596_v51, %v637_v60 }
 0x174   :  { %v687_v14 = vadd.f32 %v686_v7, %v662_v0 }
 0x176   :  { %v688_v20 = vadd.f32 %v687_v14, %v663_v6  ;;  %v724_v6 = vmul.f32 %v723_v4, %v723_v4 }
 0x178   :  { %v689_v26 = vadd.f32 %v688_v20, %v664_v13 }
 0x17a   :  { %v690_v32 = vadd.f32 %v689_v26, %v665_v19 }
 0x17c   :  { %v691_v38 = vadd.f32 %v690_v32, %v666_v25 }
 0x17e   :  { %v692_v44 = vadd.f32 %v691_v38, %v667_v31 }
 0x180   :  { %v693_v52 = vadd.f32 %v692_v44, %v668_v37 }
 0x182   :  { %v694_v56 = vadd.f32 %v693_v52, %v669_v43 }
 0x184   :  { %v695_v59 = vadd.f32 %v694_v56, %v670_v49 }
 0x186   :  { %v696_v62 = vadd.f32 %v695_v59, %v671_v55 }
 0x188   :  { %v697_v0 = vadd.f32 %v696_v62, %v672_v58 }
 0x18a   :  { %v698_v2 = vadd.f32 %v697_v0, %v673_v61 }
 0x18c   :  { %v699_v3 = vadd.f32 %v698_v2, %v674_v63 }
 0x18e   :  { %v700_v5 = vadd.f32 %v699_v3, %v675_v1 }
 0x190   :  { %701 = vadd.xlane.f32.xlu1 %v700_v5 }
 0x194   :  { %725 = vadd.xlane.f32.xlu1 %v724_v6 }
 0x1ce   :  { %v378_v7 = vpop.xlane.xlu0 %377 }
 0x1cf   :  { %v379_v8 = vrot.slane %v378_v7, 4 }
 0x1d1   :  { %v380_v9 = vadd.f32 %v379_v8, %v378_v7 }
 0x1d3   :  { %v381_v10 = vrot.slane %v380_v9, 2 }
 0x1d5   :  { %v382_v12 = vadd.f32 %v381_v10, %v380_v9 }
 0x1d7   :  { %v383_v13 = vrot.slane %v382_v12, 1 }
 0x1d9   :  { %v384_v50 = vadd.f32 %v383_v13, %v382_v12 }
 0x1da   :  { %v393_v14 = vpop.xlane.xlu0 %392 }
 0x1db   :  { %812 = vpush %v384_v50  ;;  %v394_v51 = vrot.slane %v393_v14, 4 }
 0x1dd   :  { %v395_v15 = vadd.f32 %v394_v51, %v393_v14  ;;  %v1628_v14 = vand.u32 127, %v640_v11 }
 0x1df   :  { %v396_v17 = vrot.slane %v395_v15, 2  ;;  %vm755_vm2 = vcmp.eq.s32.totalorder %v1628_v14, 2  ;;  %vm758_vm3 = vcmp.eq.s32.totalorder %v1628_v14, 1  ;;  %vm761_vm4 = vcmp.eq.s32.totalorder %v1628_v14, 10 }
 0x1e0   :  { %vm764_vm5 = vcmp.eq.s32.totalorder %v1628_v14, 3  ;;  %vm767_vm6 = vcmp.eq.s32.totalorder %v1628_v14, 4  ;;  %vm770_vm7 = vcmp.eq.s32.totalorder %v1628_v14, 5  ;;  %vm773_vm8 = vcmp.eq.s32.totalorder %v1628_v14, 6 }
 0x1e1   :  { %v408_v16 = vpop.xlane.xlu1 %407  ;;  %v397_v19 = vadd.f32 %v396_v17, %v395_v15  ;;  %vm776_vm9 = vcmp.eq.s32.totalorder %v1628_v14, 7  ;;  %vm779_vm10 = vcmp.eq.s32.totalorder %v1628_v14, 8  ;;  %vm782_vm11 = vcmp.eq.s32.totalorder %v1628_v14, 9 }
 0x1e2   :  { %v409_v18 = vrot.slane %v408_v16, 4  ;;  %vm785_vm12 = vcmp.eq.s32.totalorder %v1628_v14, 0 }
 0x1e3   :  { %v398_v22 = vrot.slane %v397_v19, 1 }
 0x1e4   :  { %v410_v20 = vadd.f32 %v409_v18, %v408_v16 }
 0x1e5   :  { %v420_v21 = vpop.xlane.xlu1 %419  ;;  %v399_v25 = vadd.f32 %v398_v22, %v397_v19 }
 0x1e6   :  { %v411_v23 = vrot.slane %v410_v20, 2  ;;  %v421_v24 = vrot.slane %v420_v21, 4 }
 0x1e7   :  { %814 = vpush %v399_v25 }
 0x1e8   :  { %v422_v26 = vadd.f32 %v421_v24, %v420_v21  ;;  %v412_v27 = vadd.f32 %v411_v23, %v410_v20 }
 0x1e9   :  { %v461_v28 = vpop.xlane.xlu1 %460 }
 0x1ea   :  { %v423_v29 = vrot.slane %v422_v26, 2  ;;  %v462_v30 = vrot.slane %v461_v28, 4  ;;  %v413_v31 = vrot.slane %v412_v27, 1 }
 0x1ec   :  { %v414_v32 = vadd.f32 %v413_v31, %v412_v27  ;;  %v424_v33 = vadd.f32 %v423_v29, %v422_v26  ;;  %v463_v34 = vadd.f32 %v462_v30, %v461_v28 }
 0x1ee   :  { %816 = vpush %v414_v32  ;;  %v425_v35 = vrot.slane %v424_v33, 1  ;;  %v464_v37 = vrot.slane %v463_v34, 2 }
 0x1f0   :  { %v426_v36 = vadd.f32 %v425_v35, %v424_v33  ;;  %v465_v40 = vadd.f32 %v464_v37, %v463_v34 }
 0x1f1   :  { %v447_v38 = vpop.xlane.xlu0 %446 }
 0x1f2   :  { %818 = vpush %v426_v36  ;;  %v448_v39 = vrot.slane %v447_v38, 4  ;;  %v466_v45 = vrot.slane %v465_v40, 1 }
 0x1f4   :  { %v449_v41 = vadd.f32 %v448_v39, %v447_v38  ;;  %v467_v52 = vadd.f32 %v466_v45, %v465_v40 }
 0x1f5   :  { %v525_v42 = vpop.xlane.xlu0 %524 }
 0x1f6   :  { %v450_v43 = vrot.slane %v449_v41, 2  ;;  %v526_v44 = vrot.slane %v525_v42, 4 }
 0x1f8   :  { %v527_v46 = vadd.f32 %v526_v44, %v525_v42  ;;  %v451_v47 = vadd.f32 %v450_v43, %v449_v41 }
 0x1f9   :  { %v714_v57 = vpop.xlane.xlu0 %713 }
 0x1fa   :  { %v528_v48 = vrot.slane %v527_v46, 2  ;;  %v452_v49 = vrot.slane %v451_v47, 1  ;;  %v715_v58 = vrot.slane %v714_v57, 4 }
 0x1fc   :  { %v453_v53 = vadd.f32 %v452_v49, %v451_v47  ;;  %v529_v54 = vadd.f32 %v528_v48, %v527_v46  ;;  %v716_v59 = vadd.f32 %v715_v58, %v714_v57 }
 0x1fe   :  { %820 = vpush %v453_v53  ;;  %v530_v55 = vrot.slane %v529_v54, 1  ;;  %v717_v60 = vrot.slane %v716_v59, 2 }
 0x1ff   :  { %822 = vpush %v467_v52 }
 0x200   :  { %v531_v56 = vadd.f32 %v530_v55, %v529_v54  ;;  %v718_v0 = vadd.f32 %v717_v60, %v716_v59 }
 0x202   :  { %824 = vpush %v531_v56  ;;  %v719_v6 = vrot.slane %v718_v0, 1 }
 0x204   :  { %v720_v12 = vadd.f32 %v719_v6, %v718_v0 }
 0x20c   :  { %s813_s0 = spop %812 }
 0x20d   :  { %s386_s1 = smul.f32 0.001, %s813_s0 }
 0x20f   :  { %v756_v51 = vstv %s386_s1 }
 0x210   :  { %v757_v15 = vsel %vm755_vm2, %v756_v51, 0.0 }
 0x218   :  { %s815_s3 = spop %814 }
 0x219   :  { %s401_s10 = smul.f32 0.00033333333, %s815_s3 }
 0x21b   :  { %s736_s26 = sadd.f32 %s401_s10, %s386_s1  ;;  %v759_v16 = vstv %s401_s10  ;;  %s1243_s10 = smov [#allocation29]  }
 0x21c   :  { %v760_v17 = vsel %vm758_vm3, %v759_v16, %v757_v15 }
 0x21d   :  { %v702_v61 = vpop.xlane.xlu1 %701 }
 0x21e   :  { %v703_v62 = vrot.slane %v702_v61, 4 }
 0x21f   :  { %s817_s29 = spop %816 }
 0x220   :  { %v704_v63 = vadd.f32 %v703_v62, %v702_v61  ;;  %s416_s8 = smul.f32 0.00033333333, %s817_s29 }
 0x221   :  { %v726_v1 = vpop.xlane.xlu1 %725 }
 0x222   :  { %v705_v2 = vrot.slane %v704_v63, 2  ;;  %v727_v3 = vrot.slane %v726_v1, 4  ;;  %s737_s17 = smul.f32 0.5, %s416_s8  ;;  %v762_v11 = vstv %s416_s8 }
 0x223   :  { %s819_s6 = spop %818  ;;  %v763_v18 = vsel %vm761_vm4, %v762_v11, %v760_v17 }
 0x224   :  { %v728_v4 = vadd.f32 %v727_v3, %v726_v1  ;;  %v706_v5 = vadd.f32 %v705_v2, %v704_v63  ;;  %s428_s30 = smul.f32 0.005, %s819_s6  ;;  %s738_s4 = sadd.f32 %s737_s17, %s736_s26 }
 0x225   :  { %s795_s6 = sshll.u32 %s1243_s10, 4  ;;  %s796_s6 = int_to_ptr.vmem [resolvable:$true] %s795_s6 }
 0x226   :  { %v729_v7 = vrot.slane %v728_v4, 2  ;;  %v707_v8 = vrot.slane %v706_v5, 1  ;;  %s739_s18 = smul.f32 0.1, %s428_s30  ;;  %v765_v19 = vstv %s428_s30  ;;  %s1184_s26 = scalar_lea.vmem %s796_s6, 16 }
 0x227   :  { %v766_v20 = vsel %vm764_vm5, %v765_v19, %v763_v18  ;;  %p1185_p8 = scmp.ne.s32.totalorder %s796_s6, %s1184_s26  ;;  %s1188_s30 = scalar_lea.vmem %s796_s6, 32 }
 0x228   :  { %v730_v9 = vadd.f32 %v729_v7, %v728_v4  ;;  %v708_v10 = vadd.f32 %v707_v8, %v706_v5  ;;  %s740_s21 = sadd.f32 %s739_s18, %s738_s4  ;;  %p1189_p9 = scmp.lt.s32.totalorder %s796_s6, %s796_s6 }
 0x229   :  { %p1190_p10 = scmp.lt.s32.totalorder %s1188_s30, %s1184_s26 }
 0x22a   :  { %826 = vpush %v708_v10  ;;  %v731_v13 = vrot.slane %v730_v9, 1 }
 0x22b   :  { %828 = vpush %v720_v12  ;;  %p1191_p11 = por %p1190_p10, %p1189_p9 }
 0x22c   :  { %v732_v50 = vadd.f32 %v731_v13, %v730_v9 }
 0x22d   :  { %p1192_p12 = pnand %p1191_p11, %p1185_p8 }
 0x22e   :  { %830 = vpush %v732_v50 }
 0x22f   :  { %s821_s16 = spop %820 }
 0x230   :  { %s455_s25 = smul.f32 0.005, %s821_s16  ;;  %s823_s15 = spop %822 }
 0x231   :  { %s469_s28 = smul.f32 0.0016666667, %s823_s15 }
 0x232   :  { %s741_s12 = smul.f32 0.1, %s455_s25  ;;  %v768_v21 = vstv %s455_s25 }
 0x233   :  { %s825_s27 = spop %824  ;;  %s743_s7 = smul.f32 0.1, %s469_s28  ;;  %v769_v22 = vsel %vm767_vm6, %v768_v21, %v766_v20  ;;  %v771_v23 = vstv %s469_s28 }
 0x234   :  { %s742_s5 = sadd.f32 %s741_s12, %s740_s21  ;;  %s533_s11 = smul.f32 0.009259259, %s825_s27  ;;  %v772_v24 = vsel %vm770_vm7, %v771_v23, %v769_v22 }
 0x236   :  { %s744_s24 = sadd.f32 %s743_s7, %s742_s5  ;;  %s745_s23 = smul.f32 10.0, %s533_s11  ;;  %v774_v25 = vstv %s533_s11 }
 0x237   :  { %v775_v27 = vsel %vm773_vm8, %v774_v25, %v772_v24 }
 0x238   :  { %s746_s19 = sadd.f32 %s745_s23, %s744_s24 }
 0x25b   :  { %s827_s9 = spop %826 }
 0x25c   :  { %s710_s13 = smul.f32 6.666667e-05, %s827_s9  ;;  %s829_s22 = spop %828 }
 0x25d   :  { %s722_s2 = smul.f32 0.0033333334, %s829_s22 }
 0x25e   :  { %s747_s20 = smul.f32 10.0, %s710_s13  ;;  %v777_v26 = vstv %s710_s13 }
 0x25f   :  { %s749_s14 = smul.f32 0.01, %s722_s2  ;;  %s831_s0 = spop %830  ;;  %v778_v28 = vsel %vm776_vm9, %v777_v26, %v775_v27  ;;  %v780_v29 = vstv %s722_s2 }
 0x260   :  { %s748_s3 = sadd.f32 %s747_s20, %s746_s19  ;;  %s734_s29 = smul.f32 0.03125, %s831_s0  ;;  %v781_v31 = vsel %vm779_vm10, %v780_v29, %v778_v28 }
 0x262   :  { %s750_s1 = sadd.f32 %s749_s14, %s748_s3  ;;  %s751_s8 = smul.f32 0.01, %s734_s29  ;;  %v783_v30 = vstv %s734_s29 }
 0x263   :  { %v784_v32 = vsel %vm782_vm11, %v783_v30, %v781_v31 }
 0x264   :  { %s752_s17 = sadd.f32 %s751_s8, %s750_s1 }
 0x266   :  { %v786_v33 = vstv %s752_s17 }
 0x267   :  { %v787_v34 = vsel %vm785_vm12, %v786_v33, %v784_v32 }
 0x268   :  { %788 = vst [vmem:[#allocation29] sm:$0x1] %v787_v34 }
 0x269   :  { %1195 = shalt.err (!%p1192_p12)
}
 0x26a   :  { %s1701_s18 = sld [smem:[#allocation47_spill]] }
 0x270   :  { %s1196_s25 = scalar_lea.hbm %s1701_s18, 16 }
 0x271   :  { %p1197_p13 = scmp.ne.s32.totalorder %s1701_s18, %s1196_s25  ;;  %p1200_p0 = scmp.lt.u32.totalorder %s1196_s25, %s1701_s18 }
 0x273   :  { %p1202_p1 = pnand %p1200_p0, %p1197_p13 }
 0x275   :  { %1205 = shalt.err (!%p1202_p1)
}
 0x276   :  { %798 = dma.vmem_to_hbm [thread:$0]  %s796_s6, 16, %s1701_s18, [#allocation7]  }
 0x277   :  { %1222 = dma.done.wait [#allocation7], 16  }
 0x278   :  { %1223 = vsyncadd [#allocation7], 4294967280 }
 0x279   :  { %802 = vsyncpa [#allocation6], 1 }
 0x27a   :  { %803 = vsyncpa [#allocation9], 1 }
 0x27b   :  { %804 = vsyncpa [#allocation12], 1 }
 0x27c   :  { %805 = vsyncpa [#allocation15], 1 }
 0x27d   :  { %806 = vsyncpa [#allocation18], 1 }
 0x27e   :  { %807 = vsyncpa [#allocation21], 1 }
 0x27f   :  { %808 = vsyncpa [#allocation24], 1 }
 0x280   :  { %809 = vsyncpa [#allocation27], 1 }
 0x281   :  { %810 = vsyncpa [#allocation7], 1 }

</bundles_post_ra>
